<compile_context>
chip_gen: v7x
topology: tpu7x:2x2x1
jax: 0.10.0
libtpu: 0.0.40
codegen_flags: <defaults>
</compile_context>

<pallas_src>
import jax
import jax.numpy as jnp
from jax import lax
from jax.experimental import pallas as pl
from jax.experimental.pallas import tpu as pltpu

# -----------------------------------------------------------------------------
# Architecture (matches the PyTorch module exactly)
# -----------------------------------------------------------------------------
LAYER_DIMS = [(640, 128), (128, 128), (128, 128), (128, 128), (128, 8),
              (8, 128), (128, 128), (128, 128), (128, 128), (128, 640)]
N_LAYERS = len(LAYER_DIMS)          # 10 linear layers
N_BN = N_LAYERS - 1                 # 9 batch-norm layers (none after the last)
BN_EPS = 1e-5

D_IN = LAYER_DIMS[0][0]             # 640
D_OUT = LAYER_DIMS[-1][1]           # 640
PAD = 128                           # lane-dense width for the 8-wide bottleneck
N_MID = 8                           # layers 1..8, all padded to (128, 128)


# -----------------------------------------------------------------------------
# Pallas kernel: full forward pass for one BN batch (one grid step)
# -----------------------------------------------------------------------------
def autoencoder_kernel(x_ref, w0_ref, wmid_ref, w9_ref, b9_ref, bn_ref, out_ref):
    # x_ref:   (B, 640)        bf16
    # w0_ref:  (640, 128)      bf16
    # wmid_ref:(8, 128, 128)   bf16  (layers 1..8; 4/5 zero-padded)
    # w9_ref:  (128, 640)      bf16
    # b9_ref:  (1, 640)        f32   (only the final, no-BN layer keeps its bias)
    # bn_ref:  (18, 128)       f32   rows 0..8 = gamma, rows 9..17 = beta
    batch = x_ref.shape[0]
    inv_b = jnp.float32(1.0 / batch)

    def bn_relu_bf16(h, i):
        # Training-mode BN over the batch.  Pre-BN linear biases are omitted:
        # the mean subtraction cancels any per-feature constant exactly.
        mean = jnp.sum(h, axis=0, keepdims=True) * inv_b
        mean_sq = jnp.sum(h * h, axis=0, keepdims=True) * inv_b
        var = jnp.maximum(mean_sq - mean * mean, 0.0)
        scale = bn_ref[i:i + 1, :] * lax.rsqrt(var + BN_EPS)          # EUP rsqrt
        shift = bn_ref[N_BN + i:N_BN + i + 1, :] - mean * scale
        # Fused FMA + ReLU + bf16 downcast (feeds the next MXU matmul directly).
        return jnp.maximum(h * scale + shift, 0.0).astype(jnp.bfloat16)

    # Layer 0 (640 -> 128): bf16 operands, f32 accumulation on the MXU.
    h = jnp.dot(x_ref[...], w0_ref[...], preferred_element_type=jnp.float32)
    h = bn_relu_bf16(h, 0)

    # Layers 1..8 (all lane-dense 128 -> 128, bottleneck zero-padded).
    for i in range(N_MID):
        h = jnp.dot(h, wmid_ref[i], preferred_element_type=jnp.float32)
        h = bn_relu_bf16(h, i + 1)

    # Layer 9 (128 -> 640): no BN, so its bias must be applied.
    h = jnp.dot(h, w9_ref[...], preferred_element_type=jnp.float32)
    out_ref[...] = (h + b9_ref[...]).astype(out_ref.dtype)


# -----------------------------------------------------------------------------
# Parameter packing (done once in the wrapper)
# -----------------------------------------------------------------------------
def pack_params(params):
    ws, bs, gammas, betas = params
    w0 = ws[0].astype(jnp.bfloat16)                                  # (640, 128)
    w9 = ws[-1].astype(jnp.bfloat16)                                 # (128, 640)
    b9 = bs[-1].reshape(1, D_OUT).astype(jnp.float32)                # (1, 640)

    mids = []
    for i in range(1, 1 + N_MID):
        fi, fo = ws[i].shape
        wp = jnp.zeros((PAD, PAD), jnp.float32).at[:fi, :fo].set(ws[i])
        mids.append(wp.astype(jnp.bfloat16))
    wmid = jnp.stack(mids)                                           # (8, 128, 128)

    g_rows, b_rows = [], []
    for i in range(N_BN):
        c = gammas[i].size
        # Pad gamma with 1 (arbitrary) and beta with 0 so padded channels stay
        # exactly 0 through BN + ReLU.
        g_rows.append(jnp.ones((PAD,), jnp.float32).at[:c].set(gammas[i].reshape(-1)))
        b_rows.append(jnp.zeros((PAD,), jnp.float32).at[:c].set(betas[i].reshape(-1)))
    bn = jnp.concatenate([jnp.stack(g_rows), jnp.stack(b_rows)], axis=0)  # (18, 128)

    return w0, wmid, w9, b9, bn


# -----------------------------------------------------------------------------
# Wrapper: x is (B, 640) for one BN batch, or (G, B, 640) for G independent
# BN batches processed on a "parallel" grid axis with VMEM-resident weights.
# -----------------------------------------------------------------------------
def autoencoder_forward(x, packed):
    w0, wmid, w9, b9, bn = packed
    squeeze = (x.ndim == 2)
    xg = (x[None] if squeeze else x).astype(jnp.bfloat16)
    G, B, _ = xg.shape

    total_mac = D_IN * PAD + N_MID * PAD * PAD + PAD * D_OUT
    cost = pl.CostEstimate(
        flops=2 * G * B * total_mac,
        transcendentals=G * N_BN * PAD,
        bytes_accessed=(xg.size * 2 + G * B * D_OUT * 4
                        + (w0.size + wmid.size + w9.size) * 2
                        + (b9.size + bn.size) * 4))

    const2 = lambda g: (0, 0)       # weights: same block every step -> DMA once
    const3 = lambda g: (0, 0, 0)

    out = pl.pallas_call(
        autoencoder_kernel,
        out_shape=jax.ShapeDtypeStruct((G, B, D_OUT), jnp.float32),
        grid=(G,),
        in_specs=[
            pl.BlockSpec((None, B, D_IN), lambda g: (g, 0, 0)),      # x (per batch)
            pl.BlockSpec((D_IN, PAD), const2),                        # W0
            pl.BlockSpec((N_MID, PAD, PAD), const3),                  # W1..W8 stack
            pl.BlockSpec((PAD, D_OUT), const2),                       # W9
            pl.BlockSpec((1, D_OUT), const2),                         # b9
            pl.BlockSpec((2 * N_BN, PAD), const2),                    # gamma/beta slab
        ],
        out_specs=pl.BlockSpec((None, B, D_OUT), lambda g: (g, 0, 0)),
        compiler_params=pltpu.CompilerParams(
            dimension_semantics=("parallel",),
            vmem_limit_bytes=16 << 20),
        cost_estimate=cost,
    )(xg, w0, wmid, w9, b9, bn)

    return out[0] if squeeze else out


# -----------------------------------------------------------------------------
# Deterministic parameter initialization (PyTorch-default-style uniform)
# -----------------------------------------------------------------------------
def init_params(key):
    ws, bs, gammas, betas = [], [], [], []
    for i, (fan_in, fan_out) in enumerate(LAYER_DIMS):
        key, kw, kb = jax.random.split(key, 3)
        bound = 1.0 / (fan_in ** 0.5)
        # Stored as (in, out) so the kernel computes x @ W (matches nn.Linear).
        w = jax.random.uniform(kw, (fan_in, fan_out), jnp.float32, -bound, bound)
        b = jax.random.uniform(kb, (1, fan_out), jnp.float32, -bound, bound)
        ws.append(w)
        bs.append(b)
        if i < N_BN:
            gammas.append(jnp.ones((1, fan_out), jnp.float32))   # BN weight = 1
            betas.append(jnp.zeros((1, fan_out), jnp.float32))   # BN bias   = 0
    return ws, bs, gammas, betas


# -----------------------------------------------------------------------------
# References
# -----------------------------------------------------------------------------
def reference_forward_mirror(x, packed):
    """Exact mirror of the kernel's numerics: same packed/padded bf16 weights,
    bias-free BN statistics, one-pass variance, fused scale/shift, bf16
    activation downcast.  (Bias dropping before training-mode BN is exact.)"""
    if x.ndim == 3:
        return jnp.stack([reference_forward_mirror(xi, packed) for xi in x])
    w0, wmid, w9, b9, bn = packed
    inv_b = jnp.float32(1.0 / x.shape[0])

    def bn_relu(h, i):
        mean = jnp.sum(h, axis=0, keepdims=True) * inv_b
        mean_sq = jnp.sum(h * h, axis=0, keepdims=True) * inv_b
        var = jnp.maximum(mean_sq - mean * mean, 0.0)
        scale = bn[i:i + 1, :] * lax.rsqrt(var + BN_EPS)
        shift = bn[N_BN + i:N_BN + i + 1, :] - mean * scale
        return jnp.maximum(h * scale + shift, 0.0).astype(jnp.bfloat16)

    h = x.astype(jnp.bfloat16)
    h = bn_relu(jnp.dot(h, w0, preferred_element_type=jnp.float32), 0)
    for i in range(N_MID):
        h = bn_relu(jnp.dot(h, wmid[i], preferred_element_type=jnp.float32), i + 1)
    return jnp.dot(h, w9, preferred_element_type=jnp.float32) + b9


def reference_forward_f32(x, params):
    """Exact PyTorch semantics, pure f32, unpadded, all biases applied."""
    ws, bs, gammas, betas = params
    h = x.astype(jnp.float32)
    for i in range(N_LAYERS):
        h = h @ ws[i] + bs[i]
        if i < N_BN:
            mean = jnp.mean(h, axis=0, keepdims=True)
            var = jnp.mean((h - mean) ** 2, axis=0, keepdims=True)
            h = (h - mean) / jnp.sqrt(var + BN_EPS)
            h = h * gammas[i] + betas[i]
            h = jnp.maximum(h, 0.0)
    return h


if __name__ == "__main__":
    key = jax.random.PRNGKey(0)
    k_x, k_p = jax.random.split(key)
    params = init_params(k_p)
    packed = pack_params(params)

    # --- single BN batch (module forward: BN statistics over the whole batch)
    x = jax.random.normal(k_x, (16, D_IN), jnp.float32)
    out = jax.block_until_ready(autoencoder_forward(x, packed))
    assert out.shape == (16, D_OUT), out.shape

    ref_mirror = reference_forward_mirror(x, packed)
    err = float(jnp.max(jnp.abs(out - ref_mirror)))
    assert jnp.allclose(out, ref_mirror, atol=2e-2, rtol=2e-2), err

    # Loose sanity check vs. pure-f32 PyTorch-semantics reference
    # (differences come only from bf16 matmul operands).
    ref32 = reference_forward_f32(x, params)
    assert float(jnp.max(jnp.abs(out - ref32))) < 0.5

    # --- multiple independent BN batches via the grid (parallel axis,
    #     weights stay VMEM resident across grid steps)
    xg = jax.random.normal(jax.random.PRNGKey(1), (2, 16, D_IN), jnp.float32)
    outg = jax.block_until_ready(autoencoder_forward(xg, packed))
    assert outg.shape == (2, 16, D_OUT), outg.shape
    refg = reference_forward_mirror(xg, packed)
    errg = float(jnp.max(jnp.abs(outg - refg)))
    assert jnp.allclose(outg, refg, atol=2e-2, rtol=2e-2), errg

    print("KERNEL_OK")
</pallas_src>

<mosaic_0001>
module attributes {stable_mosaic.version = 11 : i64} {
  func.func @autoencoder_kernel(%arg0: i32, %arg1: memref<1x16x640xbf16, #tpu.memory_space<vmem>>, %arg2: memref<640x128xbf16, #tpu.memory_space<vmem>>, %arg3: memref<8x128x128xbf16, #tpu.memory_space<vmem>>, %arg4: memref<128x640xbf16, #tpu.memory_space<vmem>>, %arg5: memref<1x640xf32, #tpu.memory_space<vmem>>, %arg6: memref<18x128xf32, #tpu.memory_space<vmem>>, %arg7: memref<1x16x640xf32, #tpu.memory_space<vmem>>) attributes {dimension_semantics = [#tpu.dimension_semantics<parallel>], iteration_bounds = array<i64: 1>, scalar_prefetch = 0 : i64, scratch_operands = 0 : i64, tpu.core_type = #tpu.core_type<tc>, window_params = [{transform_indices = @transform_0, window_bounds = array<i64: 1, 16, 640>}, {pipeline_mode = #tpu.pipeline_mode<synchronous>, transform_indices = @transform_1, window_bounds = array<i64: 640, 128>}, {pipeline_mode = #tpu.pipeline_mode<synchronous>, transform_indices = @transform_2, window_bounds = array<i64: 8, 128, 128>}, {pipeline_mode = #tpu.pipeline_mode<synchronous>, transform_indices = @transform_3, window_bounds = array<i64: 128, 640>}, {pipeline_mode = #tpu.pipeline_mode<synchronous>, transform_indices = @transform_4, window_bounds = array<i64: 1, 640>}, {pipeline_mode = #tpu.pipeline_mode<synchronous>, transform_indices = @transform_5, window_bounds = array<i64: 18, 128>}, {transform_indices = @transform_6, window_bounds = array<i64: 1, 16, 640>}]} {
    %c0 = arith.constant 0 : index
    %c0_0 = arith.constant 0 : index
    %c0_1 = arith.constant 0 : index
    %0 = vector.load %arg1[%c0, %c0_0, %c0_1] : memref<1x16x640xbf16, #tpu.memory_space<vmem>>, vector<1x16x640xbf16>
    %1 = vector.shape_cast %0 : vector<1x16x640xbf16> to vector<16x640xbf16>
    %c0_2 = arith.constant 0 : index
    %c0_3 = arith.constant 0 : index
    %2 = vector.load %arg2[%c0_2, %c0_3] : memref<640x128xbf16, #tpu.memory_space<vmem>>, vector<640x128xbf16>
    %cst = arith.constant dense<0.000000e+00> : vector<16x128xf32>
    %3 = tpu.matmul %1, %2, %cst {dimension_numbers = #tpu.dot_dimension_numbers<[1], [0], [0], [1], [0, 0, 1, 1], [], []>} : vector<16x640xbf16>, vector<640x128xbf16>, vector<16x128xf32> -> vector<16x128xf32>
    %cst_4 = arith.constant dense<0.000000e+00> : vector<128xf32>
    %4 = vector.multi_reduction <add>, %3, %cst_4 [0] : vector<16x128xf32> to vector<128xf32>
    %5 = vector.shape_cast %4 : vector<128xf32> to vector<1x128xf32>
    %cst_5 = arith.constant 6.250000e-02 : f32
    %6 = vector.broadcast %cst_5 : f32 to vector<1x128xf32>
    %7 = arith.mulf %5, %6 : vector<1x128xf32>
    %8 = arith.mulf %3, %3 : vector<16x128xf32>
    %cst_6 = arith.constant dense<0.000000e+00> : vector<128xf32>
    %9 = vector.multi_reduction <add>, %8, %cst_6 [0] : vector<16x128xf32> to vector<128xf32>
    %10 = vector.shape_cast %9 : vector<128xf32> to vector<1x128xf32>
    %cst_7 = arith.constant 6.250000e-02 : f32
    %11 = vector.broadcast %cst_7 : f32 to vector<1x128xf32>
    %12 = arith.mulf %10, %11 : vector<1x128xf32>
    %13 = arith.mulf %7, %7 : vector<1x128xf32>
    %14 = arith.subf %12, %13 : vector<1x128xf32>
    %cst_8 = arith.constant 0.000000e+00 : f32
    %15 = vector.broadcast %cst_8 : f32 to vector<1x128xf32>
    %16 = arith.maximumf %14, %15 : vector<1x128xf32>
    %c0_9 = arith.constant 0 : index
    %c0_10 = arith.constant 0 : index
    %17 = vector.load %arg6[%c0_9, %c0_10] : memref<18x128xf32, #tpu.memory_space<vmem>>, vector<1x128xf32>
    %cst_11 = arith.constant 9.99999974E-6 : f32
    %18 = vector.broadcast %cst_11 : f32 to vector<1x128xf32>
    %19 = arith.addf %16, %18 : vector<1x128xf32>
    %20 = math.rsqrt %19 : vector<1x128xf32>
    %21 = arith.mulf %17, %20 : vector<1x128xf32>
    %c9 = arith.constant 9 : index
    %c0_12 = arith.constant 0 : index
    %22 = vector.load %arg6[%c9, %c0_12] : memref<18x128xf32, #tpu.memory_space<vmem>>, vector<1x128xf32>
    %23 = arith.mulf %7, %21 : vector<1x128xf32>
    %24 = arith.subf %22, %23 : vector<1x128xf32>
    %25 = vector.broadcast %21 : vector<1x128xf32> to vector<16x128xf32>
    %26 = arith.mulf %3, %25 : vector<16x128xf32>
    %27 = vector.broadcast %24 : vector<1x128xf32> to vector<16x128xf32>
    %28 = arith.addf %26, %27 : vector<16x128xf32>
    %cst_13 = arith.constant 0.000000e+00 : f32
    %29 = vector.broadcast %cst_13 : f32 to vector<16x128xf32>
    %30 = arith.maximumf %28, %29 : vector<16x128xf32>
    %31 = arith.truncf %30 : vector<16x128xf32> to vector<16x128xbf16>
    %c0_14 = arith.constant 0 : index
    %c0_15 = arith.constant 0 : index
    %c0_16 = arith.constant 0 : index
    %32 = vector.load %arg3[%c0_14, %c0_15, %c0_16] : memref<8x128x128xbf16, #tpu.memory_space<vmem>>, vector<1x128x128xbf16>
    %33 = vector.shape_cast %32 : vector<1x128x128xbf16> to vector<128x128xbf16>
    %cst_17 = arith.constant dense<0.000000e+00> : vector<16x128xf32>
    %34 = tpu.matmul %31, %33, %cst_17 {dimension_numbers = #tpu.dot_dimension_numbers<[1], [0], [0], [1], [0, 0, 1, 1], [], []>} : vector<16x128xbf16>, vector<128x128xbf16>, vector<16x128xf32> -> vector<16x128xf32>
    %cst_18 = arith.constant dense<0.000000e+00> : vector<128xf32>
    %35 = vector.multi_reduction <add>, %34, %cst_18 [0] : vector<16x128xf32> to vector<128xf32>
    %36 = vector.shape_cast %35 : vector<128xf32> to vector<1x128xf32>
    %cst_19 = arith.constant 6.250000e-02 : f32
    %37 = vector.broadcast %cst_19 : f32 to vector<1x128xf32>
    %38 = arith.mulf %36, %37 : vector<1x128xf32>
    %39 = arith.mulf %34, %34 : vector<16x128xf32>
    %cst_20 = arith.constant dense<0.000000e+00> : vector<128xf32>
    %40 = vector.multi_reduction <add>, %39, %cst_20 [0] : vector<16x128xf32> to vector<128xf32>
    %41 = vector.shape_cast %40 : vector<128xf32> to vector<1x128xf32>
    %cst_21 = arith.constant 6.250000e-02 : f32
    %42 = vector.broadcast %cst_21 : f32 to vector<1x128xf32>
    %43 = arith.mulf %41, %42 : vector<1x128xf32>
    %44 = arith.mulf %38, %38 : vector<1x128xf32>
    %45 = arith.subf %43, %44 : vector<1x128xf32>
    %cst_22 = arith.constant 0.000000e+00 : f32
    %46 = vector.broadcast %cst_22 : f32 to vector<1x128xf32>
    %47 = arith.maximumf %45, %46 : vector<1x128xf32>
    %c1 = arith.constant 1 : index
    %c0_23 = arith.constant 0 : index
    %48 = vector.load %arg6[%c1, %c0_23] : memref<18x128xf32, #tpu.memory_space<vmem>>, vector<1x128xf32>
    %cst_24 = arith.constant 9.99999974E-6 : f32
    %49 = vector.broadcast %cst_24 : f32 to vector<1x128xf32>
    %50 = arith.addf %47, %49 : vector<1x128xf32>
    %51 = math.rsqrt %50 : vector<1x128xf32>
    %52 = arith.mulf %48, %51 : vector<1x128xf32>
    %c10 = arith.constant 10 : index
    %c0_25 = arith.constant 0 : index
    %53 = vector.load %arg6[%c10, %c0_25] : memref<18x128xf32, #tpu.memory_space<vmem>>, vector<1x128xf32>
    %54 = arith.mulf %38, %52 : vector<1x128xf32>
    %55 = arith.subf %53, %54 : vector<1x128xf32>
    %56 = vector.broadcast %52 : vector<1x128xf32> to vector<16x128xf32>
    %57 = arith.mulf %34, %56 : vector<16x128xf32>
    %58 = vector.broadcast %55 : vector<1x128xf32> to vector<16x128xf32>
    %59 = arith.addf %57, %58 : vector<16x128xf32>
    %cst_26 = arith.constant 0.000000e+00 : f32
    %60 = vector.broadcast %cst_26 : f32 to vector<16x128xf32>
    %61 = arith.maximumf %59, %60 : vector<16x128xf32>
    %62 = arith.truncf %61 : vector<16x128xf32> to vector<16x128xbf16>
    %c1_27 = arith.constant 1 : index
    %c0_28 = arith.constant 0 : index
    %c0_29 = arith.constant 0 : index
    %63 = vector.load %arg3[%c1_27, %c0_28, %c0_29] : memref<8x128x128xbf16, #tpu.memory_space<vmem>>, vector<1x128x128xbf16>
    %64 = vector.shape_cast %63 : vector<1x128x128xbf16> to vector<128x128xbf16>
    %cst_30 = arith.constant dense<0.000000e+00> : vector<16x128xf32>
    %65 = tpu.matmul %62, %64, %cst_30 {dimension_numbers = #tpu.dot_dimension_numbers<[1], [0], [0], [1], [0, 0, 1, 1], [], []>} : vector<16x128xbf16>, vector<128x128xbf16>, vector<16x128xf32> -> vector<16x128xf32>
    %cst_31 = arith.constant dense<0.000000e+00> : vector<128xf32>
    %66 = vector.multi_reduction <add>, %65, %cst_31 [0] : vector<16x128xf32> to vector<128xf32>
    %67 = vector.shape_cast %66 : vector<128xf32> to vector<1x128xf32>
    %cst_32 = arith.constant 6.250000e-02 : f32
    %68 = vector.broadcast %cst_32 : f32 to vector<1x128xf32>
    %69 = arith.mulf %67, %68 : vector<1x128xf32>
    %70 = arith.mulf %65, %65 : vector<16x128xf32>
    %cst_33 = arith.constant dense<0.000000e+00> : vector<128xf32>
    %71 = vector.multi_reduction <add>, %70, %cst_33 [0] : vector<16x128xf32> to vector<128xf32>
    %72 = vector.shape_cast %71 : vector<128xf32> to vector<1x128xf32>
    %cst_34 = arith.constant 6.250000e-02 : f32
    %73 = vector.broadcast %cst_34 : f32 to vector<1x128xf32>
    %74 = arith.mulf %72, %73 : vector<1x128xf32>
    %75 = arith.mulf %69, %69 : vector<1x128xf32>
    %76 = arith.subf %74, %75 : vector<1x128xf32>
    %cst_35 = arith.constant 0.000000e+00 : f32
    %77 = vector.broadcast %cst_35 : f32 to vector<1x128xf32>
    %78 = arith.maximumf %76, %77 : vector<1x128xf32>
    %c2 = arith.constant 2 : index
    %c0_36 = arith.constant 0 : index
    %79 = vector.load %arg6[%c2, %c0_36] : memref<18x128xf32, #tpu.memory_space<vmem>>, vector<1x128xf32>
    %cst_37 = arith.constant 9.99999974E-6 : f32
    %80 = vector.broadcast %cst_37 : f32 to vector<1x128xf32>
    %81 = arith.addf %78, %80 : vector<1x128xf32>
    %82 = math.rsqrt %81 : vector<1x128xf32>
    %83 = arith.mulf %79, %82 : vector<1x128xf32>
    %c11 = arith.constant 11 : index
    %c0_38 = arith.constant 0 : index
    %84 = vector.load %arg6[%c11, %c0_38] : memref<18x128xf32, #tpu.memory_space<vmem>>, vector<1x128xf32>
    %85 = arith.mulf %69, %83 : vector<1x128xf32>
    %86 = arith.subf %84, %85 : vector<1x128xf32>
    %87 = vector.broadcast %83 : vector<1x128xf32> to vector<16x128xf32>
    %88 = arith.mulf %65, %87 : vector<16x128xf32>
    %89 = vector.broadcast %86 : vector<1x128xf32> to vector<16x128xf32>
    %90 = arith.addf %88, %89 : vector<16x128xf32>
    %cst_39 = arith.constant 0.000000e+00 : f32
    %91 = vector.broadcast %cst_39 : f32 to vector<16x128xf32>
    %92 = arith.maximumf %90, %91 : vector<16x128xf32>
    %93 = arith.truncf %92 : vector<16x128xf32> to vector<16x128xbf16>
    %c2_40 = arith.constant 2 : index
    %c0_41 = arith.constant 0 : index
    %c0_42 = arith.constant 0 : index
    %94 = vector.load %arg3[%c2_40, %c0_41, %c0_42] : memref<8x128x128xbf16, #tpu.memory_space<vmem>>, vector<1x128x128xbf16>
    %95 = vector.shape_cast %94 : vector<1x128x128xbf16> to vector<128x128xbf16>
    %cst_43 = arith.constant dense<0.000000e+00> : vector<16x128xf32>
    %96 = tpu.matmul %93, %95, %cst_43 {dimension_numbers = #tpu.dot_dimension_numbers<[1], [0], [0], [1], [0, 0, 1, 1], [], []>} : vector<16x128xbf16>, vector<128x128xbf16>, vector<16x128xf32> -> vector<16x128xf32>
    %cst_44 = arith.constant dense<0.000000e+00> : vector<128xf32>
    %97 = vector.multi_reduction <add>, %96, %cst_44 [0] : vector<16x128xf32> to vector<128xf32>
    %98 = vector.shape_cast %97 : vector<128xf32> to vector<1x128xf32>
    %cst_45 = arith.constant 6.250000e-02 : f32
    %99 = vector.broadcast %cst_45 : f32 to vector<1x128xf32>
    %100 = arith.mulf %98, %99 : vector<1x128xf32>
    %101 = arith.mulf %96, %96 : vector<16x128xf32>
    %cst_46 = arith.constant dense<0.000000e+00> : vector<128xf32>
    %102 = vector.multi_reduction <add>, %101, %cst_46 [0] : vector<16x128xf32> to vector<128xf32>
    %103 = vector.shape_cast %102 : vector<128xf32> to vector<1x128xf32>
    %cst_47 = arith.constant 6.250000e-02 : f32
    %104 = vector.broadcast %cst_47 : f32 to vector<1x128xf32>
    %105 = arith.mulf %103, %104 : vector<1x128xf32>
    %106 = arith.mulf %100, %100 : vector<1x128xf32>
    %107 = arith.subf %105, %106 : vector<1x128xf32>
    %cst_48 = arith.constant 0.000000e+00 : f32
    %108 = vector.broadcast %cst_48 : f32 to vector<1x128xf32>
    %109 = arith.maximumf %107, %108 : vector<1x128xf32>
    %c3 = arith.constant 3 : index
    %c0_49 = arith.constant 0 : index
    %110 = vector.load %arg6[%c3, %c0_49] : memref<18x128xf32, #tpu.memory_space<vmem>>, vector<1x128xf32>
    %cst_50 = arith.constant 9.99999974E-6 : f32
    %111 = vector.broadcast %cst_50 : f32 to vector<1x128xf32>
    %112 = arith.addf %109, %111 : vector<1x128xf32>
    %113 = math.rsqrt %112 : vector<1x128xf32>
    %114 = arith.mulf %110, %113 : vector<1x128xf32>
    %c12 = arith.constant 12 : index
    %c0_51 = arith.constant 0 : index
    %115 = vector.load %arg6[%c12, %c0_51] : memref<18x128xf32, #tpu.memory_space<vmem>>, vector<1x128xf32>
    %116 = arith.mulf %100, %114 : vector<1x128xf32>
    %117 = arith.subf %115, %116 : vector<1x128xf32>
    %118 = vector.broadcast %114 : vector<1x128xf32> to vector<16x128xf32>
    %119 = arith.mulf %96, %118 : vector<16x128xf32>
    %120 = vector.broadcast %117 : vector<1x128xf32> to vector<16x128xf32>
    %121 = arith.addf %119, %120 : vector<16x128xf32>
    %cst_52 = arith.constant 0.000000e+00 : f32
    %122 = vector.broadcast %cst_52 : f32 to vector<16x128xf32>
    %123 = arith.maximumf %121, %122 : vector<16x128xf32>
    %124 = arith.truncf %123 : vector<16x128xf32> to vector<16x128xbf16>
    %c3_53 = arith.constant 3 : index
    %c0_54 = arith.constant 0 : index
    %c0_55 = arith.constant 0 : index
    %125 = vector.load %arg3[%c3_53, %c0_54, %c0_55] : memref<8x128x128xbf16, #tpu.memory_space<vmem>>, vector<1x128x128xbf16>
    %126 = vector.shape_cast %125 : vector<1x128x128xbf16> to vector<128x128xbf16>
    %cst_56 = arith.constant dense<0.000000e+00> : vector<16x128xf32>
    %127 = tpu.matmul %124, %126, %cst_56 {dimension_numbers = #tpu.dot_dimension_numbers<[1], [0], [0], [1], [0, 0, 1, 1], [], []>} : vector<16x128xbf16>, vector<128x128xbf16>, vector<16x128xf32> -> vector<16x128xf32>
    %cst_57 = arith.constant dense<0.000000e+00> : vector<128xf32>
    %128 = vector.multi_reduction <add>, %127, %cst_57 [0] : vector<16x128xf32> to vector<128xf32>
    %129 = vector.shape_cast %128 : vector<128xf32> to vector<1x128xf32>
    %cst_58 = arith.constant 6.250000e-02 : f32
    %130 = vector.broadcast %cst_58 : f32 to vector<1x128xf32>
    %131 = arith.mulf %129, %130 : vector<1x128xf32>
    %132 = arith.mulf %127, %127 : vector<16x128xf32>
    %cst_59 = arith.constant dense<0.000000e+00> : vector<128xf32>
    %133 = vector.multi_reduction <add>, %132, %cst_59 [0] : vector<16x128xf32> to vector<128xf32>
    %134 = vector.shape_cast %133 : vector<128xf32> to vector<1x128xf32>
    %cst_60 = arith.constant 6.250000e-02 : f32
    %135 = vector.broadcast %cst_60 : f32 to vector<1x128xf32>
    %136 = arith.mulf %134, %135 : vector<1x128xf32>
    %137 = arith.mulf %131, %131 : vector<1x128xf32>
    %138 = arith.subf %136, %137 : vector<1x128xf32>
    %cst_61 = arith.constant 0.000000e+00 : f32
    %139 = vector.broadcast %cst_61 : f32 to vector<1x128xf32>
    %140 = arith.maximumf %138, %139 : vector<1x128xf32>
    %c4 = arith.constant 4 : index
    %c0_62 = arith.constant 0 : index
    %141 = vector.load %arg6[%c4, %c0_62] : memref<18x128xf32, #tpu.memory_space<vmem>>, vector<1x128xf32>
    %cst_63 = arith.constant 9.99999974E-6 : f32
    %142 = vector.broadcast %cst_63 : f32 to vector<1x128xf32>
    %143 = arith.addf %140, %142 : vector<1x128xf32>
    %144 = math.rsqrt %143 : vector<1x128xf32>
    %145 = arith.mulf %141, %144 : vector<1x128xf32>
    %c13 = arith.constant 13 : index
    %c0_64 = arith.constant 0 : index
    %146 = vector.load %arg6[%c13, %c0_64] : memref<18x128xf32, #tpu.memory_space<vmem>>, vector<1x128xf32>
    %147 = arith.mulf %131, %145 : vector<1x128xf32>
    %148 = arith.subf %146, %147 : vector<1x128xf32>
    %149 = vector.broadcast %145 : vector<1x128xf32> to vector<16x128xf32>
    %150 = arith.mulf %127, %149 : vector<16x128xf32>
    %151 = vector.broadcast %148 : vector<1x128xf32> to vector<16x128xf32>
    %152 = arith.addf %150, %151 : vector<16x128xf32>
    %cst_65 = arith.constant 0.000000e+00 : f32
    %153 = vector.broadcast %cst_65 : f32 to vector<16x128xf32>
    %154 = arith.maximumf %152, %153 : vector<16x128xf32>
    %155 = arith.truncf %154 : vector<16x128xf32> to vector<16x128xbf16>
    %c4_66 = arith.constant 4 : index
    %c0_67 = arith.constant 0 : index
    %c0_68 = arith.constant 0 : index
    %156 = vector.load %arg3[%c4_66, %c0_67, %c0_68] : memref<8x128x128xbf16, #tpu.memory_space<vmem>>, vector<1x128x128xbf16>
    %157 = vector.shape_cast %156 : vector<1x128x128xbf16> to vector<128x128xbf16>
    %cst_69 = arith.constant dense<0.000000e+00> : vector<16x128xf32>
    %158 = tpu.matmul %155, %157, %cst_69 {dimension_numbers = #tpu.dot_dimension_numbers<[1], [0], [0], [1], [0, 0, 1, 1], [], []>} : vector<16x128xbf16>, vector<128x128xbf16>, vector<16x128xf32> -> vector<16x128xf32>
    %cst_70 = arith.constant dense<0.000000e+00> : vector<128xf32>
    %159 = vector.multi_reduction <add>, %158, %cst_70 [0] : vector<16x128xf32> to vector<128xf32>
    %160 = vector.shape_cast %159 : vector<128xf32> to vector<1x128xf32>
    %cst_71 = arith.constant 6.250000e-02 : f32
    %161 = vector.broadcast %cst_71 : f32 to vector<1x128xf32>
    %162 = arith.mulf %160, %161 : vector<1x128xf32>
    %163 = arith.mulf %158, %158 : vector<16x128xf32>
    %cst_72 = arith.constant dense<0.000000e+00> : vector<128xf32>
    %164 = vector.multi_reduction <add>, %163, %cst_72 [0] : vector<16x128xf32> to vector<128xf32>
    %165 = vector.shape_cast %164 : vector<128xf32> to vector<1x128xf32>
    %cst_73 = arith.constant 6.250000e-02 : f32
    %166 = vector.broadcast %cst_73 : f32 to vector<1x128xf32>
    %167 = arith.mulf %165, %166 : vector<1x128xf32>
    %168 = arith.mulf %162, %162 : vector<1x128xf32>
    %169 = arith.subf %167, %168 : vector<1x128xf32>
    %cst_74 = arith.constant 0.000000e+00 : f32
    %170 = vector.broadcast %cst_74 : f32 to vector<1x128xf32>
    %171 = arith.maximumf %169, %170 : vector<1x128xf32>
    %c5 = arith.constant 5 : index
    %c0_75 = arith.constant 0 : index
    %172 = vector.load %arg6[%c5, %c0_75] : memref<18x128xf32, #tpu.memory_space<vmem>>, vector<1x128xf32>
    %cst_76 = arith.constant 9.99999974E-6 : f32
    %173 = vector.broadcast %cst_76 : f32 to vector<1x128xf32>
    %174 = arith.addf %171, %173 : vector<1x128xf32>
    %175 = math.rsqrt %174 : vector<1x128xf32>
    %176 = arith.mulf %172, %175 : vector<1x128xf32>
    %c14 = arith.constant 14 : index
    %c0_77 = arith.constant 0 : index
    %177 = vector.load %arg6[%c14, %c0_77] : memref<18x128xf32, #tpu.memory_space<vmem>>, vector<1x128xf32>
    %178 = arith.mulf %162, %176 : vector<1x128xf32>
    %179 = arith.subf %177, %178 : vector<1x128xf32>
    %180 = vector.broadcast %176 : vector<1x128xf32> to vector<16x128xf32>
    %181 = arith.mulf %158, %180 : vector<16x128xf32>
    %182 = vector.broadcast %179 : vector<1x128xf32> to vector<16x128xf32>
    %183 = arith.addf %181, %182 : vector<16x128xf32>
    %cst_78 = arith.constant 0.000000e+00 : f32
    %184 = vector.broadcast %cst_78 : f32 to vector<16x128xf32>
    %185 = arith.maximumf %183, %184 : vector<16x128xf32>
    %186 = arith.truncf %185 : vector<16x128xf32> to vector<16x128xbf16>
    %c5_79 = arith.constant 5 : index
    %c0_80 = arith.constant 0 : index
    %c0_81 = arith.constant 0 : index
    %187 = vector.load %arg3[%c5_79, %c0_80, %c0_81] : memref<8x128x128xbf16, #tpu.memory_space<vmem>>, vector<1x128x128xbf16>
    %188 = vector.shape_cast %187 : vector<1x128x128xbf16> to vector<128x128xbf16>
    %cst_82 = arith.constant dense<0.000000e+00> : vector<16x128xf32>
    %189 = tpu.matmul %186, %188, %cst_82 {dimension_numbers = #tpu.dot_dimension_numbers<[1], [0], [0], [1], [0, 0, 1, 1], [], []>} : vector<16x128xbf16>, vector<128x128xbf16>, vector<16x128xf32> -> vector<16x128xf32>
    %cst_83 = arith.constant dense<0.000000e+00> : vector<128xf32>
    %190 = vector.multi_reduction <add>, %189, %cst_83 [0] : vector<16x128xf32> to vector<128xf32>
    %191 = vector.shape_cast %190 : vector<128xf32> to vector<1x128xf32>
    %cst_84 = arith.constant 6.250000e-02 : f32
    %192 = vector.broadcast %cst_84 : f32 to vector<1x128xf32>
    %193 = arith.mulf %191, %192 : vector<1x128xf32>
    %194 = arith.mulf %189, %189 : vector<16x128xf32>
    %cst_85 = arith.constant dense<0.000000e+00> : vector<128xf32>
    %195 = vector.multi_reduction <add>, %194, %cst_85 [0] : vector<16x128xf32> to vector<128xf32>
    %196 = vector.shape_cast %195 : vector<128xf32> to vector<1x128xf32>
    %cst_86 = arith.constant 6.250000e-02 : f32
    %197 = vector.broadcast %cst_86 : f32 to vector<1x128xf32>
    %198 = arith.mulf %196, %197 : vector<1x128xf32>
    %199 = arith.mulf %193, %193 : vector<1x128xf32>
    %200 = arith.subf %198, %199 : vector<1x128xf32>
    %cst_87 = arith.constant 0.000000e+00 : f32
    %201 = vector.broadcast %cst_87 : f32 to vector<1x128xf32>
    %202 = arith.maximumf %200, %201 : vector<1x128xf32>
    %c6 = arith.constant 6 : index
    %c0_88 = arith.constant 0 : index
    %203 = vector.load %arg6[%c6, %c0_88] : memref<18x128xf32, #tpu.memory_space<vmem>>, vector<1x128xf32>
    %cst_89 = arith.constant 9.99999974E-6 : f32
    %204 = vector.broadcast %cst_89 : f32 to vector<1x128xf32>
    %205 = arith.addf %202, %204 : vector<1x128xf32>
    %206 = math.rsqrt %205 : vector<1x128xf32>
    %207 = arith.mulf %203, %206 : vector<1x128xf32>
    %c15 = arith.constant 15 : index
    %c0_90 = arith.constant 0 : index
    %208 = vector.load %arg6[%c15, %c0_90] : memref<18x128xf32, #tpu.memory_space<vmem>>, vector<1x128xf32>
    %209 = arith.mulf %193, %207 : vector<1x128xf32>
    %210 = arith.subf %208, %209 : vector<1x128xf32>
    %211 = vector.broadcast %207 : vector<1x128xf32> to vector<16x128xf32>
    %212 = arith.mulf %189, %211 : vector<16x128xf32>
    %213 = vector.broadcast %210 : vector<1x128xf32> to vector<16x128xf32>
    %214 = arith.addf %212, %213 : vector<16x128xf32>
    %cst_91 = arith.constant 0.000000e+00 : f32
    %215 = vector.broadcast %cst_91 : f32 to vector<16x128xf32>
    %216 = arith.maximumf %214, %215 : vector<16x128xf32>
    %217 = arith.truncf %216 : vector<16x128xf32> to vector<16x128xbf16>
    %c6_92 = arith.constant 6 : index
    %c0_93 = arith.constant 0 : index
    %c0_94 = arith.constant 0 : index
    %218 = vector.load %arg3[%c6_92, %c0_93, %c0_94] : memref<8x128x128xbf16, #tpu.memory_space<vmem>>, vector<1x128x128xbf16>
    %219 = vector.shape_cast %218 : vector<1x128x128xbf16> to vector<128x128xbf16>
    %cst_95 = arith.constant dense<0.000000e+00> : vector<16x128xf32>
    %220 = tpu.matmul %217, %219, %cst_95 {dimension_numbers = #tpu.dot_dimension_numbers<[1], [0], [0], [1], [0, 0, 1, 1], [], []>} : vector<16x128xbf16>, vector<128x128xbf16>, vector<16x128xf32> -> vector<16x128xf32>
    %cst_96 = arith.constant dense<0.000000e+00> : vector<128xf32>
    %221 = vector.multi_reduction <add>, %220, %cst_96 [0] : vector<16x128xf32> to vector<128xf32>
    %222 = vector.shape_cast %221 : vector<128xf32> to vector<1x128xf32>
    %cst_97 = arith.constant 6.250000e-02 : f32
    %223 = vector.broadcast %cst_97 : f32 to vector<1x128xf32>
    %224 = arith.mulf %222, %223 : vector<1x128xf32>
    %225 = arith.mulf %220, %220 : vector<16x128xf32>
    %cst_98 = arith.constant dense<0.000000e+00> : vector<128xf32>
    %226 = vector.multi_reduction <add>, %225, %cst_98 [0] : vector<16x128xf32> to vector<128xf32>
    %227 = vector.shape_cast %226 : vector<128xf32> to vector<1x128xf32>
    %cst_99 = arith.constant 6.250000e-02 : f32
    %228 = vector.broadcast %cst_99 : f32 to vector<1x128xf32>
    %229 = arith.mulf %227, %228 : vector<1x128xf32>
    %230 = arith.mulf %224, %224 : vector<1x128xf32>
    %231 = arith.subf %229, %230 : vector<1x128xf32>
    %cst_100 = arith.constant 0.000000e+00 : f32
    %232 = vector.broadcast %cst_100 : f32 to vector<1x128xf32>
    %233 = arith.maximumf %231, %232 : vector<1x128xf32>
    %c7 = arith.constant 7 : index
    %c0_101 = arith.constant 0 : index
    %234 = vector.load %arg6[%c7, %c0_101] : memref<18x128xf32, #tpu.memory_space<vmem>>, vector<1x128xf32>
    %cst_102 = arith.constant 9.99999974E-6 : f32
    %235 = vector.broadcast %cst_102 : f32 to vector<1x128xf32>
    %236 = arith.addf %233, %235 : vector<1x128xf32>
    %237 = math.rsqrt %236 : vector<1x128xf32>
    %238 = arith.mulf %234, %237 : vector<1x128xf32>
    %c16 = arith.constant 16 : index
    %c0_103 = arith.constant 0 : index
    %239 = vector.load %arg6[%c16, %c0_103] : memref<18x128xf32, #tpu.memory_space<vmem>>, vector<1x128xf32>
    %240 = arith.mulf %224, %238 : vector<1x128xf32>
    %241 = arith.subf %239, %240 : vector<1x128xf32>
    %242 = vector.broadcast %238 : vector<1x128xf32> to vector<16x128xf32>
    %243 = arith.mulf %220, %242 : vector<16x128xf32>
    %244 = vector.broadcast %241 : vector<1x128xf32> to vector<16x128xf32>
    %245 = arith.addf %243, %244 : vector<16x128xf32>
    %cst_104 = arith.constant 0.000000e+00 : f32
    %246 = vector.broadcast %cst_104 : f32 to vector<16x128xf32>
    %247 = arith.maximumf %245, %246 : vector<16x128xf32>
    %248 = arith.truncf %247 : vector<16x128xf32> to vector<16x128xbf16>
    %c7_105 = arith.constant 7 : index
    %c0_106 = arith.constant 0 : index
    %c0_107 = arith.constant 0 : index
    %249 = vector.load %arg3[%c7_105, %c0_106, %c0_107] : memref<8x128x128xbf16, #tpu.memory_space<vmem>>, vector<1x128x128xbf16>
    %250 = vector.shape_cast %249 : vector<1x128x128xbf16> to vector<128x128xbf16>
    %cst_108 = arith.constant dense<0.000000e+00> : vector<16x128xf32>
    %251 = tpu.matmul %248, %250, %cst_108 {dimension_numbers = #tpu.dot_dimension_numbers<[1], [0], [0], [1], [0, 0, 1, 1], [], []>} : vector<16x128xbf16>, vector<128x128xbf16>, vector<16x128xf32> -> vector<16x128xf32>
    %cst_109 = arith.constant dense<0.000000e+00> : vector<128xf32>
    %252 = vector.multi_reduction <add>, %251, %cst_109 [0] : vector<16x128xf32> to vector<128xf32>
    %253 = vector.shape_cast %252 : vector<128xf32> to vector<1x128xf32>
    %cst_110 = arith.constant 6.250000e-02 : f32
    %254 = vector.broadcast %cst_110 : f32 to vector<1x128xf32>
    %255 = arith.mulf %253, %254 : vector<1x128xf32>
    %256 = arith.mulf %251, %251 : vector<16x128xf32>
    %cst_111 = arith.constant dense<0.000000e+00> : vector<128xf32>
    %257 = vector.multi_reduction <add>, %256, %cst_111 [0] : vector<16x128xf32> to vector<128xf32>
    %258 = vector.shape_cast %257 : vector<128xf32> to vector<1x128xf32>
    %cst_112 = arith.constant 6.250000e-02 : f32
    %259 = vector.broadcast %cst_112 : f32 to vector<1x128xf32>
    %260 = arith.mulf %258, %259 : vector<1x128xf32>
    %261 = arith.mulf %255, %255 : vector<1x128xf32>
    %262 = arith.subf %260, %261 : vector<1x128xf32>
    %cst_113 = arith.constant 0.000000e+00 : f32
    %263 = vector.broadcast %cst_113 : f32 to vector<1x128xf32>
    %264 = arith.maximumf %262, %263 : vector<1x128xf32>
    %c8 = arith.constant 8 : index
    %c0_114 = arith.constant 0 : index
    %265 = vector.load %arg6[%c8, %c0_114] : memref<18x128xf32, #tpu.memory_space<vmem>>, vector<1x128xf32>
    %cst_115 = arith.constant 9.99999974E-6 : f32
    %266 = vector.broadcast %cst_115 : f32 to vector<1x128xf32>
    %267 = arith.addf %264, %266 : vector<1x128xf32>
    %268 = math.rsqrt %267 : vector<1x128xf32>
    %269 = arith.mulf %265, %268 : vector<1x128xf32>
    %c17 = arith.constant 17 : index
    %c0_116 = arith.constant 0 : index
    %270 = vector.load %arg6[%c17, %c0_116] : memref<18x128xf32, #tpu.memory_space<vmem>>, vector<1x128xf32>
    %271 = arith.mulf %255, %269 : vector<1x128xf32>
    %272 = arith.subf %270, %271 : vector<1x128xf32>
    %273 = vector.broadcast %269 : vector<1x128xf32> to vector<16x128xf32>
    %274 = arith.mulf %251, %273 : vector<16x128xf32>
    %275 = vector.broadcast %272 : vector<1x128xf32> to vector<16x128xf32>
    %276 = arith.addf %274, %275 : vector<16x128xf32>
    %cst_117 = arith.constant 0.000000e+00 : f32
    %277 = vector.broadcast %cst_117 : f32 to vector<16x128xf32>
    %278 = arith.maximumf %276, %277 : vector<16x128xf32>
    %279 = arith.truncf %278 : vector<16x128xf32> to vector<16x128xbf16>
    %c0_118 = arith.constant 0 : index
    %c0_119 = arith.constant 0 : index
    %280 = vector.load %arg4[%c0_118, %c0_119] : memref<128x640xbf16, #tpu.memory_space<vmem>>, vector<128x640xbf16>
    %cst_120 = arith.constant dense<0.000000e+00> : vector<16x640xf32>
    %281 = tpu.matmul %279, %280, %cst_120 {dimension_numbers = #tpu.dot_dimension_numbers<[1], [0], [0], [1], [0, 0, 1, 1], [], []>} : vector<16x128xbf16>, vector<128x640xbf16>, vector<16x640xf32> -> vector<16x640xf32>
    %c0_121 = arith.constant 0 : index
    %c0_122 = arith.constant 0 : index
    %282 = vector.load %arg5[%c0_121, %c0_122] : memref<1x640xf32, #tpu.memory_space<vmem>>, vector<1x640xf32>
    %283 = vector.broadcast %282 : vector<1x640xf32> to vector<16x640xf32>
    %284 = arith.addf %281, %283 : vector<16x640xf32>
    %c0_123 = arith.constant 0 : index
    %c0_124 = arith.constant 0 : index
    %c0_125 = arith.constant 0 : index
    %285 = vector.load %arg7[%c0_123, %c0_124, %c0_125] : memref<1x16x640xf32, #tpu.memory_space<vmem>>, vector<1x16x640xf32>
    %286 = vector.shape_cast %285 : vector<1x16x640xf32> to vector<16x640xf32>
    %287 = vector.shape_cast %284 : vector<16x640xf32> to vector<1x16x640xf32>
    tpu.vector_store %arg7[%c0_123, %c0_124, %c0_125], %287 {strides = array<i32>} : memref<1x16x640xf32, #tpu.memory_space<vmem>>, vector<1x16x640xf32>,
    return
  }
  func.func @transform_0(%arg0: i32) -> (i32, i32, i32) {
    %c0_i32 = arith.constant 0 : i32
    %c0_i32_0 = arith.constant 0 : i32
    %c0_i32_1 = arith.constant 0 : i32
    return %arg0, %c0_i32, %c0_i32_0 : i32, i32, i32
  }
  func.func @transform_1(%arg0: i32) -> (i32, i32) {
    %c0_i32 = arith.constant 0 : i32
    %c0_i32_0 = arith.constant 0 : i32
    %c0_i32_1 = arith.constant 0 : i32
    return %c0_i32, %c0_i32_0 : i32, i32
  }
  func.func @transform_2(%arg0: i32) -> (i32, i32, i32) {
    %c0_i32 = arith.constant 0 : i32
    %c0_i32_0 = arith.constant 0 : i32
    %c0_i32_1 = arith.constant 0 : i32
    %c0_i32_2 = arith.constant 0 : i32
    return %c0_i32, %c0_i32_0, %c0_i32_1 : i32, i32, i32
  }
  func.func @transform_3(%arg0: i32) -> (i32, i32) {
    %c0_i32 = arith.constant 0 : i32
    %c0_i32_0 = arith.constant 0 : i32
    %c0_i32_1 = arith.constant 0 : i32
    return %c0_i32, %c0_i32_0 : i32, i32
  }
  func.func @transform_4(%arg0: i32) -> (i32, i32) {
    %c0_i32 = arith.constant 0 : i32
    %c0_i32_0 = arith.constant 0 : i32
    %c0_i32_1 = arith.constant 0 : i32
    return %c0_i32, %c0_i32_0 : i32, i32
  }
  func.func @transform_5(%arg0: i32) -> (i32, i32) {
    %c0_i32 = arith.constant 0 : i32
    %c0_i32_0 = arith.constant 0 : i32
    %c0_i32_1 = arith.constant 0 : i32
    return %c0_i32, %c0_i32_0 : i32, i32
  }
  func.func @transform_6(%arg0: i32) -> (i32, i32, i32) {
    %c0_i32 = arith.constant 0 : i32
    %c0_i32_0 = arith.constant 0 : i32
    %c0_i32_1 = arith.constant 0 : i32
    return %arg0, %c0_i32, %c0_i32_0 : i32, i32, i32
  }
}

</mosaic_0001>

<bundles_post_ra>
// kernel: tpu_custom_call.1
= control target key start
LH: loop header
LB: loop body
LE: loop exit
PB: predicated region body
PF: predicated region fallthrough
CT: control target
= control target key end

     0   :  { %11 = vsyncpa [#allocation3], 0  ;;  %s3327_s0 = inlined_call_operand.hbm [shape: bf16[1,16,640], index: 0, kind: input, shape index: {}]   ;;  %s3328_s1 = inlined_call_operand.hbm [shape: bf16[640,128], index: 1, kind: input, shape index: {}]   ;;  %s3329_s2 = inlined_call_operand.hbm [shape: bf16[8,128,128], index: 2, kind: input, shape index: {}]   ;;  %s3330_s3 = inlined_call_operand.hbm [shape: bf16[128,640], index: 3, kind: input, shape index: {}]   ;;  %s3331_s4 = inlined_call_operand.vmem [shape: f32[1,640], index: 4, kind: input, shape index: {}]   ;;  %s3332_s5 = inlined_call_operand.hbm [shape: f32[18,128], index: 5, kind: input, shape index: {}]   ;;  %s3333_s6 = inlined_call_operand.hbm [shape: f32[1,16,640], index: 6, kind: output, shape index: {}]  }
   0x1   :  { %12 = vsyncpa [#allocation6], 0 }
   0x2   :  { %13 = vsyncpa [#allocation9], 0 }
   0x3   :  { %14 = vsyncpa [#allocation4], 0  ;;  %s3066_s21 = smov [#allocation5]   ;;  %s2926_s25 = scalar_lea.hbm %s3328_s1, 5120 }
   0x4   :  { %s32_s22 = sshll.u32 %s3066_s21, 4  ;;  %p2927_p0 = scmp.ne.s32.totalorder %s3328_s1, %s2926_s25  ;;  %s33_s22 = int_to_ptr.vmem [resolvable:$true] %s32_s22 }
   0x5   :  { %p2930_p1 = scmp.lt.u32.totalorder %s2926_s25, %s3328_s1 }
   0x7   :  { %p2932_p2 = pnand %p2930_p1, %p2927_p0 }
   0x9   :  { %2935 = shalt.err (!%p2932_p2)
}
   0xa   :  { %s2936_s30 = scalar_lea.vmem %s33_s22, 5120  ;;  %p2941_p4 = scmp.lt.s32.totalorder %s33_s22, %s33_s22 }
   0xb   :  { %p2937_p3 = scmp.ne.s32.totalorder %s33_s22, %s2936_s30  ;;  %p2942_p5 = scmp.lt.s32.totalorder %s2936_s30, %s2936_s30 }
   0xd   :  { %p2943_p6 = por %p2942_p5, %p2941_p4 }
   0xf   :  { %p2944_p7 = pnand %p2943_p6, %p2937_p3 }
  0x11   :  { %2947 = shalt.err (!%p2944_p7)
}
  0x12   :  { %s3067_s7 = smov 64   ;;  %s3068_s8 = smov 4  }
  0x13   :  { %38 = dma.hbm_to_vmem [thread:$0]  %s3328_s1, 5120, %s33_s22, [#allocation6], %s3067_s7, %s3067_s7, %s3068_s8  }
  0x14   :  { %s3069_s11 = smov [#allocation8]   ;;  %s3070_s13 = smov [#allocation2]  }
  0x15   :  { %s56_s12 = sshll.u32 %s3069_s11, 4  ;;  %s20_s14 = sshll.u32 %s3070_s13, 4  ;;  %s57_s12 = int_to_ptr.vmem [resolvable:$true] %s56_s12  ;;  %s21_s14 = int_to_ptr.vmem [resolvable:$true] %s20_s14 }
  0x16   :  { %s2948_s17 = scalar_lea.hbm %s3330_s3, 5120 }
  0x17   :  { %p2949_p8 = scmp.ne.s32.totalorder %s3330_s3, %s2948_s17  ;;  %p2952_p9 = scmp.lt.u32.totalorder %s2948_s17, %s3330_s3 }
  0x19   :  { %p2954_p10 = pnand %p2952_p9, %p2949_p8 }
  0x1b   :  { %2957 = shalt.err (!%p2954_p10)
}
  0x1c   :  { %s2958_s1 = scalar_lea.vmem %s57_s12, 5120  ;;  %p2963_p12 = scmp.lt.s32.totalorder %s57_s12, %s57_s12 }
  0x1d   :  { %p2959_p11 = scmp.ne.s32.totalorder %s57_s12, %s2958_s1  ;;  %p2964_p13 = scmp.lt.s32.totalorder %s2958_s1, %s2958_s1 }
  0x1f   :  { %p2965_p0 = por %p2964_p13, %p2963_p12 }
  0x21   :  { %p2966_p1 = pnand %p2965_p0, %p2959_p11 }
  0x23   :  { %2969 = shalt.err (!%p2966_p1)
}
  0x24   :  { %s3071_s22 = smov 320   ;;  %s3072_s23 = smov 20  }
  0x25   :  { %62 = dma.hbm_to_vmem [thread:$0]  %s3330_s3, 5120, %s57_s12, [#allocation9], %s3071_s22, %s3071_s22, %s3072_s23  }
  0x26   :  { %s2970_s28 = scalar_lea.hbm %s3327_s0, 640 }
  0x27   :  { %p2971_p2 = scmp.ne.s32.totalorder %s3327_s0, %s2970_s28  ;;  %p2974_p3 = scmp.lt.u32.totalorder %s2970_s28, %s3327_s0 }
  0x29   :  { %p2976_p4 = pnand %p2974_p3, %p2971_p2 }
  0x2b   :  { %2979 = shalt.err (!%p2976_p4)
}
  0x2c   :  { %s2980_s11 = scalar_lea.vmem %s21_s14, 640  ;;  %p2985_p6 = scmp.lt.s32.totalorder %s21_s14, %s21_s14 }
  0x2d   :  { %p2981_p5 = scmp.ne.s32.totalorder %s21_s14, %s2980_s11  ;;  %p2986_p7 = scmp.lt.s32.totalorder %s2980_s11, %s2980_s11 }
  0x2f   :  { %p2987_p8 = por %p2986_p7, %p2985_p6 }
  0x31   :  { %p2988_p9 = pnand %p2987_p8, %p2981_p5 }
  0x33   :  { %2991 = shalt.err (!%p2988_p9)
}
  0x34   :  { %26 = dma.hbm_to_vmem [thread:$0]  %s3327_s0, 640, %s21_s14, [#allocation3], %s3071_s22, %s3071_s22, %s3072_s23  }
  0x35   :  { %s3073_s13 = smov [#allocation7]   ;;  %s3074_s16 = smov [#allocation10]  }
  0x36   :  { %s44_s15 = sshll.u32 %s3073_s13, 4  ;;  %s70_s17 = sshll.u32 %s3074_s16, 4  ;;  %s45_s15 = int_to_ptr.vmem [resolvable:$true] %s44_s15  ;;  %s71_s17 = int_to_ptr.vmem [resolvable:$true] %s70_s17 }
  0x37   :  { %s2992_s20 = scalar_lea.hbm %s3329_s2, 8192 }
  0x38   :  { %p2993_p10 = scmp.ne.s32.totalorder %s3329_s2, %s2992_s20  ;;  %p2996_p11 = scmp.lt.u32.totalorder %s2992_s20, %s3329_s2 }
  0x3a   :  { %p2998_p12 = pnand %p2996_p11, %p2993_p10 }
  0x3c   :  { %3001 = shalt.err (!%p2998_p12)
}
  0x3d   :  { %s3002_s0 = scalar_lea.vmem %s45_s15, 8192  ;;  %p3007_p0 = scmp.lt.s32.totalorder %s45_s15, %s45_s15 }
  0x3e   :  { %p3003_p13 = scmp.ne.s32.totalorder %s45_s15, %s3002_s0  ;;  %p3008_p1 = scmp.lt.s32.totalorder %s3002_s0, %s3002_s0 }
  0x40   :  { %p3009_p2 = por %p3008_p1, %p3007_p0 }
  0x42   :  { %p3010_p3 = pnand %p3009_p2, %p3003_p13 }
  0x44   :  { %3013 = shalt.err (!%p3010_p3)
}
  0x45   :  { %50 = dma.hbm_to_vmem [thread:$0]  %s3329_s2, 8192, %s45_s15, [#allocation6], %s3067_s7, %s3067_s7, %s3068_s8  }
  0x46   :  { %s3014_s27 = scalar_lea.hbm %s3332_s5, 384 }
  0x47   :  { %p3015_p4 = scmp.ne.s32.totalorder %s3332_s5, %s3014_s27  ;;  %p3018_p5 = scmp.lt.u32.totalorder %s3014_s27, %s3332_s5 }
  0x49   :  { %p3020_p6 = pnand %p3018_p5, %p3015_p4 }
  0x4b   :  { %3023 = shalt.err (!%p3020_p6)
}
  0x4c   :  { %s3024_s10 = scalar_lea.vmem %s71_s17, 384  ;;  %p3029_p8 = scmp.lt.s32.totalorder %s71_s17, %s71_s17 }
  0x4d   :  { %p3025_p7 = scmp.ne.s32.totalorder %s71_s17, %s3024_s10  ;;  %p3030_p9 = scmp.lt.s32.totalorder %s3024_s10, %s3024_s10 }
  0x4f   :  { %p3031_p10 = por %p3030_p9, %p3029_p8 }
  0x51   :  { %p3032_p11 = pnand %p3031_p10, %p3025_p7 }
  0x53   :  { %3035 = shalt.err (!%p3032_p11)
}
  0x54   :  { %s3075_s2 = smov 128   ;;  %s3076_s7 = smov 8  }
  0x55   :  { %76 = dma.hbm_to_vmem [thread:$0]  %s3332_s5, 384, %s71_s17, [#allocation9], %s3075_s2, %s3075_s2, %s3076_s7  }
  0x56   :  { %3058 = dma.done.wait [#allocation3], 640  }
  0x57   :  { %3059 = vsyncadd [#allocation3], 4294966656 }
  0x58   :  { %3060 = dma.done.wait [#allocation6], 13312  }
  0x59   :  { %3061 = vsyncadd [#allocation6], 4294953984 }
  0x5a   :  { %3062 = dma.done.wait [#allocation9], 5504  }
  0x5b   :  { %3063 = vsyncadd [#allocation9], 4294961792  ;;  %v2741_v0 = vld [vmem:[#allocation5 + $0x40] sm:$0xff]   ;;  %v2745_v4 = vld [vmem:[#allocation5 + $0x48] sm:$0xff]   ;;  %v3077_v34 = vmov 0.0   ;;  %vm3078_vm0 = vmmov 0  }
  0x5c   :  { %v2742_v1 = vld [vmem:[#allocation5 + $0xc0] sm:$0xff]   ;;  %2390 = vmatprep.subr.bf16.mxu0 %v2741_v0  ;;  %v2746_v5 = vld [vmem:[#allocation5 + $0xc8] sm:$0xff]   ;;  %v2749_v8 = vld [vmem:[#allocation5 + $0x50] sm:$0xff]  }
  0x5d   :  { %v2743_v2 = vld [vmem:[#allocation5] sm:$0xff]   ;;  %2412 = vmatprep.subr.bf16.mxu1 %v2742_v1  ;;  %v2747_v6 = vld [vmem:[#allocation5 + $0x8] sm:$0xff]   ;;  %v2750_v9 = vld [vmem:[#allocation5 + $0xd0] sm:$0xff]  }
  0x5e   :  { %v2744_v3 = vld [vmem:[#allocation5 + $0x80] sm:$0xff]   ;;  %2391 = vmatpush3.bf16.msra.mxu0 %v2743_v2  ;;  %v2748_v7 = vld [vmem:[#allocation5 + $0x88] sm:$0xff]   ;;  %v2751_v10 = vld [vmem:[#allocation5 + $0x10] sm:$0xff]  }
  0x5f   :  { %2413 = vmatpush3.bf16.msra.mxu1 %v2744_v3  ;;  %2392 = vmatprep.subr.bf16.mxu0 %v2745_v4  ;;  %v2752_v11 = vld [vmem:[#allocation5 + $0x90] sm:$0xff]   ;;  %v2753_v12 = vld [vmem:[#allocation5 + $0x58] sm:$0xff]   ;;  %v2757_v16 = vld [vmem:[#allocation5 + $0x60] sm:$0xff]  }
  0x60   :  { %2414 = vmatprep.subr.bf16.mxu1 %v2746_v5  ;;  %v2754_v13 = vld [vmem:[#allocation5 + $0xd8] sm:$0xff]   ;;  %v2758_v17 = vld [vmem:[#allocation5 + $0xe0] sm:$0xff]   ;;  %v2761_v20 = vld [vmem:[#allocation5 + $0x68] sm:$0xff]  }
  0x61   :  { %v2755_v14 = vld [vmem:[#allocation5 + $0x18] sm:$0xff]   ;;  %v2759_v18 = vld [vmem:[#allocation5 + $0x20] sm:$0xff]   ;;  %v2762_v21 = vld [vmem:[#allocation5 + $0xe8] sm:$0xff]  }
  0x62   :  { %2393 = vmatpush3.bf16.msra.mxu0 %v2747_v6  ;;  %v2756_v15 = vld [vmem:[#allocation5 + $0x98] sm:$0xff]   ;;  %v2760_v19 = vld [vmem:[#allocation5 + $0xa0] sm:$0xff]   ;;  %v2763_v22 = vld [vmem:[#allocation5 + $0x28] sm:$0xff]  }
  0x63   :  { %2415 = vmatpush3.bf16.msra.mxu1 %v2748_v7  ;;  %2394 = vmatprep.subr.bf16.mxu0 %v2749_v8  ;;  %v2764_v23 = vld [vmem:[#allocation5 + $0xa8] sm:$0xff]   ;;  %v2765_v24 = vld [vmem:[#allocation5 + $0x70] sm:$0xff]   ;;  %v2769_v28 = vld [vmem:[#allocation5 + $0x78] sm:$0xff]  }
  0x64   :  { %2416 = vmatprep.subr.bf16.mxu1 %v2750_v9  ;;  %v2766_v25 = vld [vmem:[#allocation5 + $0xf0] sm:$0xff]   ;;  %v2770_v29 = vld [vmem:[#allocation5 + $0xf8] sm:$0xff]   ;;  %v2779_v37 = vld [vmem:[#allocation5 + $0x100] sm:$0xff]  }
  0x65   :  { %v2767_v26 = vld [vmem:[#allocation5 + $0x30] sm:$0xff]   ;;  %v2771_v30 = vld [vmem:[#allocation5 + $0x38] sm:$0xff]   ;;  %v2780_v38 = vld [vmem:[#allocation5 + $0x108] sm:$0xff]  }
  0x66   :  { %2395 = vmatpush3.bf16.msra.mxu0 %v2751_v10  ;;  %v2768_v27 = vld [vmem:[#allocation5 + $0xb0] sm:$0xff]   ;;  %v2772_v31 = vld [vmem:[#allocation5 + $0xb8] sm:$0xff]   ;;  %v2783_v41 = vld [vmem:[#allocation5 + $0x120] sm:$0xff]  }
  0x67   :  { %2417 = vmatpush3.bf16.msra.mxu1 %v2752_v11  ;;  %2396 = vmatprep.subr.bf16.mxu0 %v2753_v12  ;;  %v2773_v32 = vld [vmem:[#allocation2] ss:$20 sps:$4 sm:$0xff]   ;;  %v2775_v33 = vld [vmem:[#allocation2 + $0x4] ss:$20 sps:$4 sm:$0xff]   ;;  %v2776_v35 = vld [vmem:[#allocation2 + $0x8] ss:$20 sps:$4 sm:$0xff]  }
  0x68   :  { %2418 = vmatprep.subr.bf16.mxu1 %v2754_v13  ;;  %v2778_v36 = vld [vmem:[#allocation2 + $0xc] ss:$20 sps:$4 sm:$0xff]   ;;  %477 = vmatprep.mubr.bf16.mxu0 %v2775_v33  ;;  %v2781_v39 = vld [vmem:[#allocation5 + $0x110] sm:$0xff]   ;;  %v2784_v42 = vld [vmem:[#allocation5 + $0x128] sm:$0xff]  }
  0x69   :  { %518 = vmatprep.mubr.bf16.mxu1 %v2778_v36  ;;  %v2782_v40 = vld [vmem:[#allocation5 + $0x118] sm:$0xff]   ;;  %v2785_v43 = vld [vmem:[#allocation5 + $0x130] sm:$0xff]   ;;  %v2788_v46 = vld [vmem:[#allocation7] sm:$0xff]  }
  0x6a   :  { %2397 = vmatpush3.bf16.msra.mxu0 %v2755_v14  ;;  %v2786_v44 = vld [vmem:[#allocation5 + $0x138] sm:$0xff]   ;;  %v2789_v47 = vld [vmem:[#allocation7 + $0x8] sm:$0xff]   ;;  %v2790_v48 = vld [vmem:[#allocation7 + $0x10] sm:$0xff]  }
  0x6b   :  { %2419 = vmatpush3.bf16.msra.mxu1 %v2756_v15  ;;  %2398 = vmatprep.subr.bf16.mxu0 %v2757_v16  ;;  %v2787_v45 = vld [vmem:[#allocation2 + $0x10] ss:$20 sps:$4 sm:$0xff]   ;;  %v2792_v50 = vld [vmem:[#allocation7 + $0x20] sm:$0xff]   ;;  %v2794_v52 = vld [vmem:[#allocation7 + $0x30] sm:$0xff]  }
  0x6c   :  { %2420 = vmatprep.subr.bf16.mxu1 %v2758_v17  ;;  %v2791_v49 = vld [vmem:[#allocation7 + $0x18] sm:$0xff]   ;;  %v2793_v51 = vld [vmem:[#allocation7 + $0x28] sm:$0xff]  }
  0x6d   :  { %v2795_v53 = vld [vmem:[#allocation7 + $0x38] sm:$0xff]  }
  0x6e   :  { %2399 = vmatpush3.bf16.msra.mxu0 %v2759_v18 }
  0x6f   :  { %2421 = vmatpush3.bf16.msra.mxu1 %v2760_v19  ;;  %2400 = vmatprep.subr.bf16.mxu0 %v2761_v20 }
  0x70   :  { %2422 = vmatprep.subr.bf16.mxu1 %v2762_v21 }
  0x72   :  { %2401 = vmatpush3.bf16.msra.mxu0 %v2763_v22 }
  0x73   :  { %2423 = vmatpush3.bf16.msra.mxu1 %v2764_v23  ;;  %2402 = vmatprep.subr.bf16.mxu0 %v2765_v24 }
  0x74   :  { %2424 = vmatprep.subr.bf16.mxu1 %v2766_v25 }
  0x76   :  { %2403 = vmatpush3.bf16.msra.mxu0 %v2767_v26 }
  0x77   :  { %2425 = vmatpush3.bf16.msra.mxu1 %v2768_v27  ;;  %2404 = vmatprep.subr.bf16.mxu0 %v2769_v28 }
  0x78   :  { %2426 = vmatprep.subr.bf16.mxu1 %v2770_v29 }
  0x7a   :  { %2405 = vmatpush3.bf16.msra.mxu0 %v2771_v30 }
  0x7b   :  { %2427 = vmatpush3.bf16.msra.mxu1 %v2772_v31  ;;  %2524 = vmatprep.subr.bf16.mxu0 %v3077_v34 }
  0x7c   :  { %2544 = vmatprep.subr.bf16.mxu1 %v3077_v34 }
  0x7d   :  { %478 = vmatmul.mubr.bf16.vlgmr.msra.gmra.mrb[0].mxu0 %v2773_v32  ;;  %v596_v32 = vlaneseq }
  0x7e   :  { %519 = vmatmul.mubr.bf16.vlgmr.msra.gmra.mrb[0].mxu1 %v2776_v35  ;;  %2525 = vmatpush3.bf16.msra.mxu0 %v2779_v37  ;;  %v589_v35 = vld [vmem:[#allocation10] sm:$0x1] }
  0x7f   :  { %2526 = vmatprep.subr.bf16.mxu0 %v3077_v34  ;;  %2540 = vmatprep.mubr.msk.bf16.mxu0 %vm3078_vm0, %v3077_v34  ;;  %v3208_v33 = vshrl.u32 %v596_v32, 7 }
  0x80   :  { %2560 = vmatprep.mubr.msk.bf16.mxu1 %vm3078_vm0, %v3077_v34  ;;  %2545 = vmatpush3.bf16.msra.mxu1 %v2788_v46 }
  0x81   :  { %2546 = vmatprep.subr.bf16.mxu1 %v3077_v34  ;;  %v3211_v36 = vsub.s32 0, %v3208_v33 }
  0x82   :  { %2527 = vmatpush3.bf16.msra.mxu0 %v2780_v38 }
  0x83   :  { %2528 = vmatprep.subr.bf16.mxu0 %v3077_v34 }
  0x84   :  { %2547 = vmatpush3.bf16.msra.mxu1 %v2789_v47 }
  0x85   :  { %2548 = vmatprep.subr.bf16.mxu1 %v3077_v34 }
  0x86   :  { %2529 = vmatpush3.bf16.msra.mxu0 %v2781_v39  ;;  %v593_v39 = vld [vmem:[#allocation10 + $0x9] sm:$0x1] }
  0x87   :  { %2530 = vmatprep.subr.bf16.mxu0 %v3077_v34 }
  0x88   :  { %2549 = vmatpush3.bf16.msra.mxu1 %v2790_v48 }
  0x89   :  { %2550 = vmatprep.subr.bf16.mxu1 %v3077_v34 }
  0x8a   :  { %2531 = vmatpush3.bf16.msra.mxu0 %v2782_v40 }
  0x8b   :  { %2532 = vmatprep.subr.bf16.mxu0 %v3077_v34 }
  0x8c   :  { %2551 = vmatpush3.bf16.msra.mxu1 %v2791_v49 }
  0x8d   :  { %2552 = vmatprep.subr.bf16.mxu1 %v3077_v34 }
  0x8e   :  { %2533 = vmatpush3.bf16.msra.mxu0 %v2783_v41 }
  0x8f   :  { %2534 = vmatprep.subr.bf16.mxu0 %v3077_v34 }
  0x90   :  { %2553 = vmatpush3.bf16.msra.mxu1 %v2792_v50 }
  0x91   :  { %2554 = vmatprep.subr.bf16.mxu1 %v3077_v34 }
  0x92   :  { %2535 = vmatpush3.bf16.msra.mxu0 %v2784_v42 }
  0x93   :  { %2536 = vmatprep.subr.bf16.mxu0 %v3077_v34 }
  0x94   :  { %2555 = vmatpush3.bf16.msra.mxu1 %v2793_v51  ;;  %v2796_v51 = vld [vmem:[#allocation7 + $0x40] sm:$0xff]  }
  0x95   :  { %2556 = vmatprep.subr.bf16.mxu1 %v3077_v34 }
  0x96   :  { %2537 = vmatpush3.bf16.msra.mxu0 %v2785_v43 }
  0x97   :  { %2538 = vmatprep.subr.bf16.mxu0 %v3077_v34 }
  0x98   :  { %2557 = vmatpush3.bf16.msra.mxu1 %v2794_v52  ;;  %v2797_v52 = vld [vmem:[#allocation7 + $0x48] sm:$0xff]  }
  0x99   :  { %2558 = vmatprep.subr.bf16.mxu1 %v3077_v34 }
  0x9a   :  { %2539 = vmatpush3.bf16.msra.mxu0 %v2786_v44 }
  0x9b   :  { %2564 = vmatprep.subr.bf16.mxu0 %v3077_v34 }
  0x9c   :  { %2559 = vmatpush3.bf16.msra.mxu1 %v2795_v53  ;;  %v2798_v53 = vld [vmem:[#allocation7 + $0x50] sm:$0xff]  }
  0x9d   :  { %2541 = vmatmul.mubr.bf16.vlgmr.msra.gmra.mrb[4].mxu0 %v2787_v45  ;;  %2584 = vmatprep.subr.bf16.mxu1 %v3077_v34 }
  0x9e   :  { %2580 = vmatprep.mubr.msk.bf16.mxu0 %vm3078_vm0, %v3077_v34  ;;  %2565 = vmatpush3.bf16.msra.mxu0 %v2796_v51 }
  0x9f   :  { %2566 = vmatprep.subr.bf16.mxu0 %v3077_v34 }
  0xa2   :  { %2567 = vmatpush3.bf16.msra.mxu0 %v2797_v52 }
  0xa3   :  { %2568 = vmatprep.subr.bf16.mxu0 %v3077_v34 }
  0xa6   :  { %2569 = vmatpush3.bf16.msra.mxu0 %v2798_v53 }
  0xa7   :  { %2570 = vmatprep.subr.bf16.mxu0 %v3077_v34 }
 0x150   :  { %v2406_v54 = vpop.f32.mrb[0].mxu0 }
 0x151   :  { %v2428_v55 = vpop.f32.mrb[0].mxu1  ;;  %v2407_v56 = vpop.f32.mrb[1].mxu0 }
 0x152   :  { %v2408_v57 = vadd.f32 %v2407_v56, %v2406_v54  ;;  %v2429_v58 = vpop.f32.mrb[1].mxu1  ;;  %v2409_v59 = vpop.f32.mrb[2].mxu0  ;;  %v2799_v54 = vld [vmem:[#allocation7 + $0x58] sm:$0xff]   ;;  %v2801_v56 = vld [vmem:[#allocation7 + $0x68] sm:$0xff]  }
 0x153   :  { %v2430_v60 = vadd.f32 %v2429_v58, %v2428_v55  ;;  %v2431_v61 = vpop.f32.mrb[2].mxu1  ;;  %v2410_v62 = vpop.f32.mrb[3].mxu0  ;;  %2571 = vmatpush3.bf16.msra.mxu0 %v2799_v54  ;;  %v2800_v55 = vld [vmem:[#allocation7 + $0x60] sm:$0xff]   ;;  %v2803_v58 = vld [vmem:[#allocation7 + $0x78] sm:$0xff]  }
 0x154   :  { %v2411_v63 = vadd.f32 %v2410_v62, %v2409_v59  ;;  %v2432_v0 = vpop.f32.mrb[3].mxu1  ;;  %2572 = vmatprep.subr.bf16.mxu0 %v3077_v34 }
 0x155   :  { %v2433_v1 = vadd.f32 %v2432_v0, %v2431_v61  ;;  %v521_v2 = vadd.f32 %v2430_v60, %v2408_v57  ;;  %v2802_v57 = vld [vmem:[#allocation7 + $0x70] sm:$0xff]  }
 0x157   :  { %v524_v3 = vadd.f32 %v2433_v1, %v2411_v63  ;;  %2573 = vmatpush3.bf16.msra.mxu0 %v2800_v55 }
 0x158   :  { %2574 = vmatprep.subr.bf16.mxu0 %v3077_v34 }
 0x15b   :  { %2575 = vmatpush3.bf16.msra.mxu0 %v2801_v56 }
 0x15c   :  { %2576 = vmatprep.subr.bf16.mxu0 %v3077_v34 }
 0x15f   :  { %2577 = vmatpush3.bf16.msra.mxu0 %v2802_v57 }
 0x160   :  { %2578 = vmatprep.subr.bf16.mxu0 %v3077_v34 }
 0x163   :  { %2579 = vmatpush3.bf16.msra.mxu0 %v2803_v58 }
 0x164   :  { %2604 = vmatprep.subr.bf16.mxu0 %v3077_v34 }
 0x170   :  { %v561_v4 = vpop.f32.mrb[4].mxu0 }
 0x171   :  { %v562_v5 = vadd.f32 %v561_v4, %v521_v2  ;;  %v2542_v6 = vpop.f32.mrb[5].mxu0 }
 0x172   :  { %v564_v7 = vpop.f32.mrb[6].mxu0 }
 0x173   :  { %v565_v8 = vadd.f32 %v564_v7, %v524_v3  ;;  %v2543_v9 = vpop.f32.mrb[7].mxu0  ;;  %v576_v10 = vmul.f32 %v562_v5, %v562_v5 }
 0x175   :  { %v568_v11 = vadd.f32 %v565_v8, %v562_v5  ;;  %v577_v12 = vmul.f32 %v565_v8, %v565_v8 }
 0x177   :  { %v569_v13 = vrot.slane %v568_v11, 4  ;;  %v578_v14 = vadd.f32 %v577_v12, %v576_v10 }
 0x179   :  { %v570_v15 = vadd.f32 %v569_v13, %v568_v11  ;;  %v579_v16 = vrot.slane %v578_v14, 4 }
 0x17b   :  { %v571_v17 = vrot.slane %v570_v15, 2  ;;  %v580_v18 = vadd.f32 %v579_v16, %v578_v14 }
 0x17d   :  { %v572_v19 = vadd.f32 %v571_v17, %v570_v15  ;;  %v581_v20 = vrot.slane %v580_v18, 2 }
 0x17f   :  { %v573_v21 = vrot.slane %v572_v19, 1  ;;  %v582_v22 = vadd.f32 %v581_v20, %v580_v18 }
 0x181   :  { %v574_v23 = vadd.f32 %v573_v21, %v572_v19  ;;  %v583_v24 = vrot.slane %v582_v22, 1  ;;  %v737_v21 = vld [vmem:[#allocation10 + $0x1] sm:$0x1] }
 0x183   :  { %v575_v25 = vmul.f32 0.0625, %v574_v23  ;;  %v584_v26 = vadd.f32 %v583_v24, %v582_v22  ;;  %v741_v24 = vld [vmem:[#allocation10 + $0xa] sm:$0x1] }
 0x185   :  { %v585_v27 = vmul.f32 0.0625, %v584_v26  ;;  %v586_v28 = vmul.f32 %v575_v25, %v575_v25 }
 0x187   :  { %v587_v29 = vsub.f32 %v585_v27, %v586_v28 }
 0x189   :  { %v588_v30 = vmax.f32 %v587_v29, 0.0 }
 0x18b   :  { %v590_v31 = vadd.f32 1e-05, %v588_v30 }
 0x18d   :  { %2908 = vrsqrt.f32 %v590_v31 }
 0x197   :  { %v2909_v37 = vpop.eup %2908 }
 0x198   :  { %v592_v38 = vmul.f32 %v2909_v37, %v589_v35 }
 0x19a   :  { %v594_v40 = vmul.f32 %v592_v38, %v575_v25  ;;  %v599_v41 = vrot.slane %v592_v38, %v3211_v36 }
 0x19c   :  { %v595_v42 = vsub.f32 %v593_v39, %v594_v40  ;;  %v600_v43 = vmul.f32 %v599_v41, %v562_v5  ;;  %v601_v44 = vmul.f32 %v599_v41, %v565_v8  ;;  %v2804_v39 = vld [vmem:[#allocation7 + $0x80] sm:$0xff]   ;;  %v2805_v40 = vld [vmem:[#allocation7 + $0x88] sm:$0xff]   ;;  %v2806_v41 = vld [vmem:[#allocation7 + $0x90] sm:$0xff]  }
 0x19e   :  { %v605_v45 = vrot.slane %v595_v42, %v3211_v36  ;;  %v2807_v42 = vld [vmem:[#allocation7 + $0x98] sm:$0xff]  }
 0x1a0   :  { %v607_v46 = vadd.f32 %v605_v45, %v601_v44  ;;  %v606_v47 = vadd.f32 %v605_v45, %v600_v43  ;;  %v2808_v43 = vld [vmem:[#allocation7 + $0xa0] sm:$0xff]   ;;  %v2809_v44 = vld [vmem:[#allocation7 + $0xa8] sm:$0xff]   ;;  %v2810_v45 = vld [vmem:[#allocation7 + $0xb0] sm:$0xff]  }
 0x1a2   :  { %v609_v48 = vmax.f32 %v607_v46, 0.0  ;;  %v608_v49 = vmax.f32 %v606_v47, 0.0  ;;  %v2811_v46 = vld [vmem:[#allocation7 + $0xb8] sm:$0xff]  }
 0x1a4   :  { %v610_v50 = vpack.c.bf16 %v609_v48, %v608_v49 }
 0x1a6   :  { %2561 = vmatmul.mubr.bf16.vlgmr.msra.gmra.mrb[4].mxu1 %v610_v50 }
 0x1a7   :  { %2600 = vmatprep.mubr.msk.bf16.mxu1 %vm3078_vm0, %v3077_v34  ;;  %2585 = vmatpush3.bf16.msra.mxu1 %v2804_v39 }
 0x1a8   :  { %2586 = vmatprep.subr.bf16.mxu1 %v3077_v34 }
 0x1ab   :  { %2587 = vmatpush3.bf16.msra.mxu1 %v2805_v40 }
 0x1ac   :  { %2588 = vmatprep.subr.bf16.mxu1 %v3077_v34 }
 0x1af   :  { %2589 = vmatpush3.bf16.msra.mxu1 %v2806_v41 }
 0x1b0   :  { %2590 = vmatprep.subr.bf16.mxu1 %v3077_v34 }
 0x1b3   :  { %2591 = vmatpush3.bf16.msra.mxu1 %v2807_v42 }
 0x1b4   :  { %2592 = vmatprep.subr.bf16.mxu1 %v3077_v34 }
 0x1b7   :  { %2593 = vmatpush3.bf16.msra.mxu1 %v2808_v43 }
 0x1b8   :  { %2594 = vmatprep.subr.bf16.mxu1 %v3077_v34 }
 0x1bb   :  { %2595 = vmatpush3.bf16.msra.mxu1 %v2809_v44 }
 0x1bc   :  { %2596 = vmatprep.subr.bf16.mxu1 %v3077_v34 }
 0x1bf   :  { %2597 = vmatpush3.bf16.msra.mxu1 %v2810_v45 }
 0x1c0   :  { %2598 = vmatprep.subr.bf16.mxu1 %v3077_v34 }
 0x1c3   :  { %2599 = vmatpush3.bf16.msra.mxu1 %v2811_v46 }
 0x1c4   :  { %2624 = vmatprep.subr.bf16.mxu1 %v3077_v34 }
 0x279   :  { %v709_v59 = vpop.f32.mrb[4].mxu1 }
 0x27a   :  { %v2562_v60 = vpop.f32.mrb[5].mxu1  ;;  %v724_v62 = vmul.f32 %v709_v59, %v709_v59 }
 0x27b   :  { %v712_v61 = vpop.f32.mrb[6].mxu1 }
 0x27c   :  { %v716_v63 = vadd.f32 %v712_v61, %v709_v59  ;;  %v725_v0 = vmul.f32 %v712_v61, %v712_v61  ;;  %v2563_v1 = vpop.f32.mrb[7].mxu1 }
 0x27e   :  { %v717_v2 = vrot.slane %v716_v63, 4  ;;  %v726_v3 = vadd.f32 %v725_v0, %v724_v62 }
 0x280   :  { %v718_v4 = vadd.f32 %v717_v2, %v716_v63  ;;  %v727_v5 = vrot.slane %v726_v3, 4 }
 0x282   :  { %v719_v6 = vrot.slane %v718_v4, 2  ;;  %v728_v7 = vadd.f32 %v727_v5, %v726_v3 }
 0x284   :  { %v720_v8 = vadd.f32 %v719_v6, %v718_v4  ;;  %v729_v9 = vrot.slane %v728_v7, 2 }
 0x286   :  { %v721_v10 = vrot.slane %v720_v8, 1  ;;  %v730_v11 = vadd.f32 %v729_v9, %v728_v7  ;;  %v886_v9 = vld [vmem:[#allocation10 + $0x2] sm:$0x1] }
 0x288   :  { %v722_v12 = vadd.f32 %v721_v10, %v720_v8  ;;  %v731_v13 = vrot.slane %v730_v11, 1 }
 0x28a   :  { %v723_v14 = vmul.f32 0.0625, %v722_v12  ;;  %v732_v15 = vadd.f32 %v731_v13, %v730_v11  ;;  %v890_v12 = vld [vmem:[#allocation10 + $0xb] sm:$0x1] }
 0x28c   :  { %v733_v16 = vmul.f32 0.0625, %v732_v15  ;;  %v734_v17 = vmul.f32 %v723_v14, %v723_v14 }
 0x28e   :  { %v735_v18 = vsub.f32 %v733_v16, %v734_v17 }
 0x290   :  { %v736_v19 = vmax.f32 %v735_v18, 0.0 }
 0x292   :  { %v738_v20 = vadd.f32 1e-05, %v736_v19 }
 0x294   :  { %2910 = vrsqrt.f32 %v738_v20 }
 0x29e   :  { %v2911_v22 = vpop.eup %2910 }
 0x29f   :  { %v740_v23 = vmul.f32 %v2911_v22, %v737_v21 }
 0x2a1   :  { %v742_v25 = vmul.f32 %v740_v23, %v723_v14  ;;  %v747_v26 = vrot.slane %v740_v23, %v3211_v36 }
 0x2a3   :  { %v743_v27 = vsub.f32 %v741_v24, %v742_v25  ;;  %v748_v28 = vmul.f32 %v747_v26, %v709_v59  ;;  %v749_v29 = vmul.f32 %v747_v26, %v712_v61  ;;  %v2812_v24 = vld [vmem:[#allocation7 + $0xc0] sm:$0xff]   ;;  %v2813_v25 = vld [vmem:[#allocation7 + $0xc8] sm:$0xff]   ;;  %v2814_v26 = vld [vmem:[#allocation7 + $0xd0] sm:$0xff]  }
 0x2a5   :  { %v753_v30 = vrot.slane %v743_v27, %v3211_v36  ;;  %v2815_v27 = vld [vmem:[#allocation7 + $0xd8] sm:$0xff]  }
 0x2a7   :  { %v754_v31 = vadd.f32 %v753_v30, %v748_v28  ;;  %v755_v32 = vadd.f32 %v753_v30, %v749_v29  ;;  %v2816_v28 = vld [vmem:[#allocation7 + $0xe0] sm:$0xff]   ;;  %v2817_v29 = vld [vmem:[#allocation7 + $0xe8] sm:$0xff]   ;;  %v2818_v30 = vld [vmem:[#allocation7 + $0xf0] sm:$0xff]  }
 0x2a9   :  { %v757_v35 = vmax.f32 %v755_v32, 0.0  ;;  %v756_v37 = vmax.f32 %v754_v31, 0.0  ;;  %v2819_v31 = vld [vmem:[#allocation7 + $0xf8] sm:$0xff]  }
 0x2ab   :  { %v758_v38 = vpack.c.bf16 %v757_v35, %v756_v37 }
 0x2ad   :  { %2581 = vmatmul.mubr.bf16.vlgmr.msra.gmra.mrb[8].mxu0 %v758_v38 }
 0x2ae   :  { %2620 = vmatprep.mubr.msk.bf16.mxu0 %vm3078_vm0, %v3077_v34  ;;  %2605 = vmatpush3.bf16.msra.mxu0 %v2812_v24 }
 0x2af   :  { %2606 = vmatprep.subr.bf16.mxu0 %v3077_v34 }
 0x2b2   :  { %2607 = vmatpush3.bf16.msra.mxu0 %v2813_v25 }
 0x2b3   :  { %2608 = vmatprep.subr.bf16.mxu0 %v3077_v34 }
 0x2b6   :  { %2609 = vmatpush3.bf16.msra.mxu0 %v2814_v26 }
 0x2b7   :  { %2610 = vmatprep.subr.bf16.mxu0 %v3077_v34 }
 0x2ba   :  { %2611 = vmatpush3.bf16.msra.mxu0 %v2815_v27 }
 0x2bb   :  { %2612 = vmatprep.subr.bf16.mxu0 %v3077_v34 }
 0x2be   :  { %2613 = vmatpush3.bf16.msra.mxu0 %v2816_v28 }
 0x2bf   :  { %2614 = vmatprep.subr.bf16.mxu0 %v3077_v34 }
 0x2c2   :  { %2615 = vmatpush3.bf16.msra.mxu0 %v2817_v29 }
 0x2c3   :  { %2616 = vmatprep.subr.bf16.mxu0 %v3077_v34 }
 0x2c6   :  { %2617 = vmatpush3.bf16.msra.mxu0 %v2818_v30 }
 0x2c7   :  { %2618 = vmatprep.subr.bf16.mxu0 %v3077_v34 }
 0x2ca   :  { %2619 = vmatpush3.bf16.msra.mxu0 %v2819_v31 }
 0x2cb   :  { %2644 = vmatprep.subr.bf16.mxu0 %v3077_v34 }
 0x380   :  { %v858_v47 = vpop.f32.mrb[8].mxu0 }
 0x381   :  { %v2582_v48 = vpop.f32.mrb[9].mxu0  ;;  %v873_v50 = vmul.f32 %v858_v47, %v858_v47 }
 0x382   :  { %v861_v49 = vpop.f32.mrb[10].mxu0 }
 0x383   :  { %v865_v51 = vadd.f32 %v861_v49, %v858_v47  ;;  %v874_v52 = vmul.f32 %v861_v49, %v861_v49  ;;  %v2583_v53 = vpop.f32.mrb[11].mxu0 }
 0x385   :  { %v866_v54 = vrot.slane %v865_v51, 4  ;;  %v875_v55 = vadd.f32 %v874_v52, %v873_v50 }
 0x387   :  { %v867_v56 = vadd.f32 %v866_v54, %v865_v51  ;;  %v876_v57 = vrot.slane %v875_v55, 4 }
 0x389   :  { %v868_v58 = vrot.slane %v867_v56, 2  ;;  %v877_v59 = vadd.f32 %v876_v57, %v875_v55 }
 0x38b   :  { %v869_v60 = vadd.f32 %v868_v58, %v867_v56  ;;  %v878_v61 = vrot.slane %v877_v59, 2 }
 0x38d   :  { %v870_v62 = vrot.slane %v869_v60, 1  ;;  %v879_v63 = vadd.f32 %v878_v61, %v877_v59  ;;  %v1035_v61 = vld [vmem:[#allocation10 + $0x3] sm:$0x1] }
 0x38f   :  { %v871_v0 = vadd.f32 %v870_v62, %v869_v60  ;;  %v880_v1 = vrot.slane %v879_v63, 1 }
 0x391   :  { %v872_v2 = vmul.f32 0.0625, %v871_v0  ;;  %v881_v3 = vadd.f32 %v880_v1, %v879_v63  ;;  %v1039_v0 = vld [vmem:[#allocation10 + $0xc] sm:$0x1] }
 0x393   :  { %v882_v4 = vmul.f32 0.0625, %v881_v3  ;;  %v883_v5 = vmul.f32 %v872_v2, %v872_v2 }
 0x395   :  { %v884_v6 = vsub.f32 %v882_v4, %v883_v5 }
 0x397   :  { %v885_v7 = vmax.f32 %v884_v6, 0.0 }
 0x399   :  { %v887_v8 = vadd.f32 1e-05, %v885_v7 }
 0x39b   :  { %2912 = vrsqrt.f32 %v887_v8 }
 0x3a5   :  { %v2913_v10 = vpop.eup %2912 }
 0x3a6   :  { %v889_v11 = vmul.f32 %v2913_v10, %v886_v9 }
 0x3a8   :  { %v891_v13 = vmul.f32 %v889_v11, %v872_v2  ;;  %v896_v14 = vrot.slane %v889_v11, %v3211_v36 }
 0x3aa   :  { %v892_v15 = vsub.f32 %v890_v12, %v891_v13  ;;  %v897_v16 = vmul.f32 %v896_v14, %v858_v47  ;;  %v898_v17 = vmul.f32 %v896_v14, %v861_v49  ;;  %v2820_v12 = vld [vmem:[#allocation7 + $0x100] sm:$0xff]   ;;  %v2821_v13 = vld [vmem:[#allocation7 + $0x108] sm:$0xff]   ;;  %v2822_v14 = vld [vmem:[#allocation7 + $0x110] sm:$0xff]  }
 0x3ac   :  { %v902_v18 = vrot.slane %v892_v15, %v3211_v36  ;;  %v2823_v15 = vld [vmem:[#allocation7 + $0x118] sm:$0xff]  }
 0x3ae   :  { %v903_v19 = vadd.f32 %v902_v18, %v897_v16  ;;  %v904_v20 = vadd.f32 %v902_v18, %v898_v17  ;;  %v2824_v16 = vld [vmem:[#allocation7 + $0x120] sm:$0xff]   ;;  %v2825_v17 = vld [vmem:[#allocation7 + $0x128] sm:$0xff]   ;;  %v2826_v18 = vld [vmem:[#allocation7 + $0x130] sm:$0xff]  }
 0x3b0   :  { %v906_v21 = vmax.f32 %v904_v20, 0.0  ;;  %v905_v22 = vmax.f32 %v903_v19, 0.0  ;;  %v2827_v19 = vld [vmem:[#allocation7 + $0x138] sm:$0xff]  }
 0x3b2   :  { %v907_v23 = vpack.c.bf16 %v906_v21, %v905_v22 }
 0x3b4   :  { %2601 = vmatmul.mubr.bf16.vlgmr.msra.gmra.mrb[8].mxu1 %v907_v23 }
 0x3b5   :  { %2640 = vmatprep.mubr.msk.bf16.mxu1 %vm3078_vm0, %v3077_v34  ;;  %2625 = vmatpush3.bf16.msra.mxu1 %v2820_v12 }
 0x3b6   :  { %2626 = vmatprep.subr.bf16.mxu1 %v3077_v34 }
 0x3b9   :  { %2627 = vmatpush3.bf16.msra.mxu1 %v2821_v13 }
 0x3ba   :  { %2628 = vmatprep.subr.bf16.mxu1 %v3077_v34 }
 0x3bd   :  { %2629 = vmatpush3.bf16.msra.mxu1 %v2822_v14 }
 0x3be   :  { %2630 = vmatprep.subr.bf16.mxu1 %v3077_v34 }
 0x3c1   :  { %2631 = vmatpush3.bf16.msra.mxu1 %v2823_v15 }
 0x3c2   :  { %2632 = vmatprep.subr.bf16.mxu1 %v3077_v34 }
 0x3c5   :  { %2633 = vmatpush3.bf16.msra.mxu1 %v2824_v16 }
 0x3c6   :  { %2634 = vmatprep.subr.bf16.mxu1 %v3077_v34 }
 0x3c9   :  { %2635 = vmatpush3.bf16.msra.mxu1 %v2825_v17 }
 0x3ca   :  { %2636 = vmatprep.subr.bf16.mxu1 %v3077_v34 }
 0x3cd   :  { %2637 = vmatpush3.bf16.msra.mxu1 %v2826_v18 }
 0x3ce   :  { %2638 = vmatprep.subr.bf16.mxu1 %v3077_v34 }
 0x3d1   :  { %2639 = vmatpush3.bf16.msra.mxu1 %v2827_v19 }
 0x3d2   :  { %2664 = vmatprep.subr.bf16.mxu1 %v3077_v34 }
 0x487   :  { %v1007_v32 = vpop.f32.mrb[8].mxu1 }
 0x488   :  { %v2602_v35 = vpop.f32.mrb[9].mxu1  ;;  %v1022_v38 = vmul.f32 %v1007_v32, %v1007_v32 }
 0x489   :  { %v1010_v37 = vpop.f32.mrb[10].mxu1 }
 0x48a   :  { %v1014_v39 = vadd.f32 %v1010_v37, %v1007_v32  ;;  %v1023_v40 = vmul.f32 %v1010_v37, %v1010_v37  ;;  %v2603_v41 = vpop.f32.mrb[11].mxu1 }
 0x48c   :  { %v1015_v42 = vrot.slane %v1014_v39, 4  ;;  %v1024_v43 = vadd.f32 %v1023_v40, %v1022_v38 }
 0x48e   :  { %v1016_v44 = vadd.f32 %v1015_v42, %v1014_v39  ;;  %v1025_v45 = vrot.slane %v1024_v43, 4 }
 0x490   :  { %v1017_v46 = vrot.slane %v1016_v44, 2  ;;  %v1026_v47 = vadd.f32 %v1025_v45, %v1024_v43 }
 0x492   :  { %v1018_v48 = vadd.f32 %v1017_v46, %v1016_v44  ;;  %v1027_v49 = vrot.slane %v1026_v47, 2 }
 0x494   :  { %v1019_v50 = vrot.slane %v1018_v48, 1  ;;  %v1028_v51 = vadd.f32 %v1027_v49, %v1026_v47  ;;  %v1184_v49 = vld [vmem:[#allocation10 + $0x4] sm:$0x1] }
 0x496   :  { %v1020_v52 = vadd.f32 %v1019_v50, %v1018_v48  ;;  %v1029_v53 = vrot.slane %v1028_v51, 1 }
 0x498   :  { %v1021_v54 = vmul.f32 0.0625, %v1020_v52  ;;  %v1030_v55 = vadd.f32 %v1029_v53, %v1028_v51  ;;  %v1188_v52 = vld [vmem:[#allocation10 + $0xd] sm:$0x1] }
 0x49a   :  { %v1031_v56 = vmul.f32 0.0625, %v1030_v55  ;;  %v1032_v57 = vmul.f32 %v1021_v54, %v1021_v54 }
 0x49c   :  { %v1033_v58 = vsub.f32 %v1031_v56, %v1032_v57 }
 0x49e   :  { %v1034_v59 = vmax.f32 %v1033_v58, 0.0 }
 0x4a0   :  { %v1036_v60 = vadd.f32 1e-05, %v1034_v59 }
 0x4a2   :  { %2914 = vrsqrt.f32 %v1036_v60 }
 0x4ac   :  { %v2915_v62 = vpop.eup %2914 }
 0x4ad   :  { %v1038_v63 = vmul.f32 %v2915_v62, %v1035_v61 }
 0x4af   :  { %v1040_v1 = vmul.f32 %v1038_v63, %v1021_v54  ;;  %v1045_v2 = vrot.slane %v1038_v63, %v3211_v36 }
 0x4b1   :  { %v1041_v3 = vsub.f32 %v1039_v0, %v1040_v1  ;;  %v1046_v4 = vmul.f32 %v1045_v2, %v1007_v32  ;;  %v1047_v5 = vmul.f32 %v1045_v2, %v1010_v37  ;;  %v2828_v0 = vld [vmem:[#allocation7 + $0x140] sm:$0xff]   ;;  %v2829_v1 = vld [vmem:[#allocation7 + $0x148] sm:$0xff]   ;;  %v2830_v2 = vld [vmem:[#allocation7 + $0x150] sm:$0xff]  }
 0x4b3   :  { %v1051_v6 = vrot.slane %v1041_v3, %v3211_v36  ;;  %v2831_v3 = vld [vmem:[#allocation7 + $0x158] sm:$0xff]  }
 0x4b5   :  { %v1052_v7 = vadd.f32 %v1051_v6, %v1046_v4  ;;  %v1053_v8 = vadd.f32 %v1051_v6, %v1047_v5  ;;  %v2832_v4 = vld [vmem:[#allocation7 + $0x160] sm:$0xff]   ;;  %v2833_v5 = vld [vmem:[#allocation7 + $0x168] sm:$0xff]   ;;  %v2834_v6 = vld [vmem:[#allocation7 + $0x170] sm:$0xff]  }
 0x4b7   :  { %v1055_v9 = vmax.f32 %v1053_v8, 0.0  ;;  %v1054_v10 = vmax.f32 %v1052_v7, 0.0  ;;  %v2835_v7 = vld [vmem:[#allocation7 + $0x178] sm:$0xff]  }
 0x4b9   :  { %v1056_v11 = vpack.c.bf16 %v1055_v9, %v1054_v10 }
 0x4bb   :  { %2621 = vmatmul.mubr.bf16.vlgmr.msra.gmra.mrb[12].mxu0 %v1056_v11 }
 0x4bc   :  { %2660 = vmatprep.mubr.msk.bf16.mxu0 %vm3078_vm0, %v3077_v34  ;;  %2645 = vmatpush3.bf16.msra.mxu0 %v2828_v0 }
 0x4bd   :  { %2646 = vmatprep.subr.bf16.mxu0 %v3077_v34 }
 0x4c0   :  { %2647 = vmatpush3.bf16.msra.mxu0 %v2829_v1 }
 0x4c1   :  { %2648 = vmatprep.subr.bf16.mxu0 %v3077_v34 }
 0x4c4   :  { %2649 = vmatpush3.bf16.msra.mxu0 %v2830_v2 }
 0x4c5   :  { %2650 = vmatprep.subr.bf16.mxu0 %v3077_v34 }
 0x4c8   :  { %2651 = vmatpush3.bf16.msra.mxu0 %v2831_v3 }
 0x4c9   :  { %2652 = vmatprep.subr.bf16.mxu0 %v3077_v34 }
 0x4cc   :  { %2653 = vmatpush3.bf16.msra.mxu0 %v2832_v4 }
 0x4cd   :  { %2654 = vmatprep.subr.bf16.mxu0 %v3077_v34 }
 0x4d0   :  { %2655 = vmatpush3.bf16.msra.mxu0 %v2833_v5 }
 0x4d1   :  { %2656 = vmatprep.subr.bf16.mxu0 %v3077_v34 }
 0x4d4   :  { %2657 = vmatpush3.bf16.msra.mxu0 %v2834_v6 }
 0x4d5   :  { %2658 = vmatprep.subr.bf16.mxu0 %v3077_v34 }
 0x4d8   :  { %2659 = vmatpush3.bf16.msra.mxu0 %v2835_v7 }
 0x4d9   :  { %2684 = vmatprep.subr.bf16.mxu0 %v3077_v34 }
 0x58e   :  { %v1156_v20 = vpop.f32.mrb[12].mxu0 }
 0x58f   :  { %v2622_v21 = vpop.f32.mrb[13].mxu0  ;;  %v1171_v23 = vmul.f32 %v1156_v20, %v1156_v20 }
 0x590   :  { %v1159_v22 = vpop.f32.mrb[14].mxu0 }
 0x591   :  { %v1163_v24 = vadd.f32 %v1159_v22, %v1156_v20  ;;  %v1172_v25 = vmul.f32 %v1159_v22, %v1159_v22  ;;  %v2623_v26 = vpop.f32.mrb[15].mxu0 }
 0x593   :  { %v1164_v27 = vrot.slane %v1163_v24, 4  ;;  %v1173_v28 = vadd.f32 %v1172_v25, %v1171_v23 }
 0x595   :  { %v1165_v29 = vadd.f32 %v1164_v27, %v1163_v24  ;;  %v1174_v30 = vrot.slane %v1173_v28, 4 }
 0x597   :  { %v1166_v31 = vrot.slane %v1165_v29, 2  ;;  %v1175_v32 = vadd.f32 %v1174_v30, %v1173_v28 }
 0x599   :  { %v1167_v35 = vadd.f32 %v1166_v31, %v1165_v29  ;;  %v1176_v37 = vrot.slane %v1175_v32, 2 }
 0x59b   :  { %v1168_v38 = vrot.slane %v1167_v35, 1  ;;  %v1177_v39 = vadd.f32 %v1176_v37, %v1175_v32  ;;  %v1333_v37 = vld [vmem:[#allocation10 + $0x5] sm:$0x1] }
 0x59d   :  { %v1169_v40 = vadd.f32 %v1168_v38, %v1167_v35  ;;  %v1178_v41 = vrot.slane %v1177_v39, 1 }
 0x59f   :  { %v1170_v42 = vmul.f32 0.0625, %v1169_v40  ;;  %v1179_v43 = vadd.f32 %v1178_v41, %v1177_v39  ;;  %v1337_v40 = vld [vmem:[#allocation10 + $0xe] sm:$0x1] }
 0x5a1   :  { %v1180_v44 = vmul.f32 0.0625, %v1179_v43  ;;  %v1181_v45 = vmul.f32 %v1170_v42, %v1170_v42 }
 0x5a3   :  { %v1182_v46 = vsub.f32 %v1180_v44, %v1181_v45 }
 0x5a5   :  { %v1183_v47 = vmax.f32 %v1182_v46, 0.0 }
 0x5a7   :  { %v1185_v48 = vadd.f32 1e-05, %v1183_v47 }
 0x5a9   :  { %2916 = vrsqrt.f32 %v1185_v48 }
 0x5b3   :  { %v2917_v50 = vpop.eup %2916 }
 0x5b4   :  { %v1187_v51 = vmul.f32 %v2917_v50, %v1184_v49 }
 0x5b6   :  { %v1189_v53 = vmul.f32 %v1187_v51, %v1170_v42  ;;  %v1194_v54 = vrot.slane %v1187_v51, %v3211_v36 }
 0x5b8   :  { %v1190_v55 = vsub.f32 %v1188_v52, %v1189_v53  ;;  %v1195_v56 = vmul.f32 %v1194_v54, %v1156_v20  ;;  %v1196_v57 = vmul.f32 %v1194_v54, %v1159_v22  ;;  %v2836_v52 = vld [vmem:[#allocation7 + $0x180] sm:$0xff]   ;;  %v2837_v53 = vld [vmem:[#allocation7 + $0x188] sm:$0xff]   ;;  %v2838_v54 = vld [vmem:[#allocation7 + $0x190] sm:$0xff]  }
 0x5ba   :  { %v1200_v58 = vrot.slane %v1190_v55, %v3211_v36  ;;  %v2839_v55 = vld [vmem:[#allocation7 + $0x198] sm:$0xff]  }
 0x5bc   :  { %v1201_v59 = vadd.f32 %v1200_v58, %v1195_v56  ;;  %v1202_v60 = vadd.f32 %v1200_v58, %v1196_v57  ;;  %v2840_v56 = vld [vmem:[#allocation7 + $0x1a0] sm:$0xff]   ;;  %v2841_v57 = vld [vmem:[#allocation7 + $0x1a8] sm:$0xff]   ;;  %v2842_v58 = vld [vmem:[#allocation7 + $0x1b0] sm:$0xff]  }
 0x5be   :  { %v1204_v61 = vmax.f32 %v1202_v60, 0.0  ;;  %v1203_v62 = vmax.f32 %v1201_v59, 0.0  ;;  %v2843_v59 = vld [vmem:[#allocation7 + $0x1b8] sm:$0xff]  }
 0x5c0   :  { %v1205_v63 = vpack.c.bf16 %v1204_v61, %v1203_v62 }
 0x5c2   :  { %2641 = vmatmul.mubr.bf16.vlgmr.msra.gmra.mrb[12].mxu1 %v1205_v63 }
 0x5c3   :  { %2680 = vmatprep.mubr.msk.bf16.mxu1 %vm3078_vm0, %v3077_v34  ;;  %2665 = vmatpush3.bf16.msra.mxu1 %v2836_v52 }
 0x5c4   :  { %2666 = vmatprep.subr.bf16.mxu1 %v3077_v34 }
 0x5c7   :  { %2667 = vmatpush3.bf16.msra.mxu1 %v2837_v53 }
 0x5c8   :  { %2668 = vmatprep.subr.bf16.mxu1 %v3077_v34 }
 0x5cb   :  { %2669 = vmatpush3.bf16.msra.mxu1 %v2838_v54 }
 0x5cc   :  { %2670 = vmatprep.subr.bf16.mxu1 %v3077_v34 }
 0x5cf   :  { %2671 = vmatpush3.bf16.msra.mxu1 %v2839_v55 }
 0x5d0   :  { %2672 = vmatprep.subr.bf16.mxu1 %v3077_v34 }
 0x5d3   :  { %2673 = vmatpush3.bf16.msra.mxu1 %v2840_v56 }
 0x5d4   :  { %2674 = vmatprep.subr.bf16.mxu1 %v3077_v34 }
 0x5d7   :  { %2675 = vmatpush3.bf16.msra.mxu1 %v2841_v57 }
 0x5d8   :  { %2676 = vmatprep.subr.bf16.mxu1 %v3077_v34 }
 0x5db   :  { %2677 = vmatpush3.bf16.msra.mxu1 %v2842_v58 }
 0x5dc   :  { %2678 = vmatprep.subr.bf16.mxu1 %v3077_v34 }
 0x5df   :  { %2679 = vmatpush3.bf16.msra.mxu1 %v2843_v59 }
 0x695   :  { %v1305_v8 = vpop.f32.mrb[12].mxu1 }
 0x696   :  { %v2642_v9 = vpop.f32.mrb[13].mxu1  ;;  %v1320_v11 = vmul.f32 %v1305_v8, %v1305_v8 }
 0x697   :  { %v1308_v10 = vpop.f32.mrb[14].mxu1 }
 0x698   :  { %v1312_v12 = vadd.f32 %v1308_v10, %v1305_v8  ;;  %v1321_v13 = vmul.f32 %v1308_v10, %v1308_v10  ;;  %v2643_v14 = vpop.f32.mrb[15].mxu1 }
 0x69a   :  { %v1313_v15 = vrot.slane %v1312_v12, 4  ;;  %v1322_v16 = vadd.f32 %v1321_v13, %v1320_v11 }
 0x69c   :  { %v1314_v17 = vadd.f32 %v1313_v15, %v1312_v12  ;;  %v1323_v18 = vrot.slane %v1322_v16, 4 }
 0x69e   :  { %v1315_v19 = vrot.slane %v1314_v17, 2  ;;  %v1324_v20 = vadd.f32 %v1323_v18, %v1322_v16 }
 0x6a0   :  { %v1316_v21 = vadd.f32 %v1315_v19, %v1314_v17  ;;  %v1325_v22 = vrot.slane %v1324_v20, 2 }
 0x6a2   :  { %v1317_v23 = vrot.slane %v1316_v21, 1  ;;  %v1326_v24 = vadd.f32 %v1325_v22, %v1324_v20  ;;  %v1482_v22 = vld [vmem:[#allocation10 + $0x6] sm:$0x1] }
 0x6a4   :  { %v1318_v25 = vadd.f32 %v1317_v23, %v1316_v21  ;;  %v1327_v26 = vrot.slane %v1326_v24, 1 }
 0x6a6   :  { %v1319_v27 = vmul.f32 0.0625, %v1318_v25  ;;  %v1328_v28 = vadd.f32 %v1327_v26, %v1326_v24  ;;  %v1486_v25 = vld [vmem:[#allocation10 + $0xf] sm:$0x1] }
 0x6a8   :  { %v1329_v29 = vmul.f32 0.0625, %v1328_v28  ;;  %v1330_v30 = vmul.f32 %v1319_v27, %v1319_v27 }
 0x6aa   :  { %v1331_v31 = vsub.f32 %v1329_v29, %v1330_v30 }
 0x6ac   :  { %v1332_v32 = vmax.f32 %v1331_v31, 0.0 }
 0x6ae   :  { %v1334_v35 = vadd.f32 1e-05, %v1332_v32 }
 0x6b0   :  { %2918 = vrsqrt.f32 %v1334_v35 }
 0x6ba   :  { %v2919_v38 = vpop.eup %2918 }
 0x6bb   :  { %v1336_v39 = vmul.f32 %v2919_v38, %v1333_v37 }
 0x6bd   :  { %v1338_v41 = vmul.f32 %v1336_v39, %v1319_v27  ;;  %v1343_v42 = vrot.slane %v1336_v39, %v3211_v36 }
 0x6bf   :  { %v1339_v43 = vsub.f32 %v1337_v40, %v1338_v41  ;;  %v1344_v44 = vmul.f32 %v1343_v42, %v1305_v8  ;;  %v1345_v45 = vmul.f32 %v1343_v42, %v1308_v10  ;;  %v2844_v40 = vld [vmem:[#allocation7 + $0x1c0] sm:$0xff]   ;;  %v2845_v41 = vld [vmem:[#allocation7 + $0x1c8] sm:$0xff]   ;;  %v2846_v42 = vld [vmem:[#allocation7 + $0x1d0] sm:$0xff]  }
 0x6c1   :  { %v1349_v46 = vrot.slane %v1339_v43, %v3211_v36  ;;  %v2847_v43 = vld [vmem:[#allocation7 + $0x1d8] sm:$0xff]  }
 0x6c3   :  { %v1350_v47 = vadd.f32 %v1349_v46, %v1344_v44  ;;  %v1351_v48 = vadd.f32 %v1349_v46, %v1345_v45  ;;  %v2848_v44 = vld [vmem:[#allocation7 + $0x1e0] sm:$0xff]   ;;  %v2849_v45 = vld [vmem:[#allocation7 + $0x1e8] sm:$0xff]   ;;  %v2850_v46 = vld [vmem:[#allocation7 + $0x1f0] sm:$0xff]  }
 0x6c5   :  { %v1353_v49 = vmax.f32 %v1351_v48, 0.0  ;;  %v1352_v50 = vmax.f32 %v1350_v47, 0.0  ;;  %v2851_v47 = vld [vmem:[#allocation7 + $0x1f8] sm:$0xff]  }
 0x6c7   :  { %v1354_v51 = vpack.c.bf16 %v1353_v49, %v1352_v50 }
 0x6c9   :  { %2661 = vmatmul.mubr.bf16.vlgmr.msra.gmra.mrb[16].mxu0 %v1354_v51 }
 0x6ca   :  { %2700 = vmatprep.mubr.msk.bf16.mxu0 %vm3078_vm0, %v3077_v34  ;;  %2685 = vmatpush3.bf16.msra.mxu0 %v2844_v40  ;;  %v2872_v40 = vld [vmem:[#allocation8 + $0x7c] ss:$20 sps:$4 sm:$0xff]  }
 0x6cb   :  { %2686 = vmatprep.subr.bf16.mxu0 %v3077_v34 }
 0x6ce   :  { %2687 = vmatpush3.bf16.msra.mxu0 %v2845_v41  ;;  %v2870_v41 = vld [vmem:[#allocation8 + $0x78] ss:$20 sps:$4 sm:$0xff]  }
 0x6cf   :  { %2688 = vmatprep.subr.bf16.mxu0 %v3077_v34 }
 0x6d2   :  { %2689 = vmatpush3.bf16.msra.mxu0 %v2846_v42  ;;  %v2875_v42 = vld [vmem:[#allocation8 + $0x84] ss:$20 sps:$4 sm:$0xff]  }
 0x6d3   :  { %2690 = vmatprep.subr.bf16.mxu0 %v3077_v34 }
 0x6d6   :  { %2691 = vmatpush3.bf16.msra.mxu0 %v2847_v43  ;;  %v2873_v43 = vld [vmem:[#allocation8 + $0x80] ss:$20 sps:$4 sm:$0xff]  }
 0x6d7   :  { %2692 = vmatprep.subr.bf16.mxu0 %v3077_v34 }
 0x6da   :  { %2693 = vmatpush3.bf16.msra.mxu0 %v2848_v44  ;;  %v2878_v44 = vld [vmem:[#allocation8 + $0xa4] ss:$20 sps:$4 sm:$0xff]  }
 0x6db   :  { %2694 = vmatprep.subr.bf16.mxu0 %v3077_v34 }
 0x6de   :  { %2695 = vmatpush3.bf16.msra.mxu0 %v2849_v45  ;;  %v2876_v45 = vld [vmem:[#allocation8 + $0xa0] ss:$20 sps:$4 sm:$0xff]  }
 0x6df   :  { %2696 = vmatprep.subr.bf16.mxu0 %v3077_v34 }
 0x6e2   :  { %2697 = vmatpush3.bf16.msra.mxu0 %v2850_v46  ;;  %v2881_v46 = vld [vmem:[#allocation8 + $0xac] ss:$20 sps:$4 sm:$0xff]  }
 0x6e3   :  { %2698 = vmatprep.subr.bf16.mxu0 %v3077_v34 }
 0x6e6   :  { %2699 = vmatpush3.bf16.msra.mxu0 %v2851_v47  ;;  %v2879_v47 = vld [vmem:[#allocation8 + $0xa8] ss:$20 sps:$4 sm:$0xff]  }
 0x79c   :  { %v1454_v60 = vpop.f32.mrb[16].mxu0 }
 0x79d   :  { %v2662_v61 = vpop.f32.mrb[17].mxu0  ;;  %v1469_v63 = vmul.f32 %v1454_v60, %v1454_v60 }
 0x79e   :  { %v1457_v62 = vpop.f32.mrb[18].mxu0 }
 0x79f   :  { %v1461_v0 = vadd.f32 %v1457_v62, %v1454_v60  ;;  %v1470_v1 = vmul.f32 %v1457_v62, %v1457_v62  ;;  %v2663_v2 = vpop.f32.mrb[19].mxu0 }
 0x7a1   :  { %v1462_v3 = vrot.slane %v1461_v0, 4  ;;  %v1471_v4 = vadd.f32 %v1470_v1, %v1469_v63 }
 0x7a3   :  { %v1463_v5 = vadd.f32 %v1462_v3, %v1461_v0  ;;  %v1472_v6 = vrot.slane %v1471_v4, 4 }
 0x7a5   :  { %v1464_v7 = vrot.slane %v1463_v5, 2  ;;  %v1473_v8 = vadd.f32 %v1472_v6, %v1471_v4 }
 0x7a7   :  { %v1465_v9 = vadd.f32 %v1464_v7, %v1463_v5  ;;  %v1474_v10 = vrot.slane %v1473_v8, 2 }
 0x7a9   :  { %v1466_v11 = vrot.slane %v1465_v9, 1  ;;  %v1475_v12 = vadd.f32 %v1474_v10, %v1473_v8  ;;  %v1631_v10 = vld [vmem:[#allocation10 + $0x7] sm:$0x1] }
 0x7ab   :  { %v1467_v13 = vadd.f32 %v1466_v11, %v1465_v9  ;;  %v1476_v14 = vrot.slane %v1475_v12, 1 }
 0x7ad   :  { %v1468_v15 = vmul.f32 0.0625, %v1467_v13  ;;  %v1477_v16 = vadd.f32 %v1476_v14, %v1475_v12  ;;  %v1635_v13 = vld [vmem:[#allocation10 + $0x10] sm:$0x1] }
 0x7af   :  { %v1478_v17 = vmul.f32 0.0625, %v1477_v16  ;;  %v1479_v18 = vmul.f32 %v1468_v15, %v1468_v15 }
 0x7b1   :  { %v1480_v19 = vsub.f32 %v1478_v17, %v1479_v18 }
 0x7b3   :  { %v1481_v20 = vmax.f32 %v1480_v19, 0.0 }
 0x7b5   :  { %v1483_v21 = vadd.f32 1e-05, %v1481_v20 }
 0x7b7   :  { %2920 = vrsqrt.f32 %v1483_v21 }
 0x7c1   :  { %v2921_v23 = vpop.eup %2920 }
 0x7c2   :  { %v1485_v24 = vmul.f32 %v2921_v23, %v1482_v22 }
 0x7c4   :  { %v1487_v26 = vmul.f32 %v1485_v24, %v1468_v15  ;;  %v1492_v27 = vrot.slane %v1485_v24, %v3211_v36 }
 0x7c6   :  { %v1488_v28 = vsub.f32 %v1486_v25, %v1487_v26  ;;  %v1493_v29 = vmul.f32 %v1492_v27, %v1454_v60  ;;  %v1494_v30 = vmul.f32 %v1492_v27, %v1457_v62  ;;  %v2854_v25 = vld [vmem:[#allocation8 + $0x4] ss:$20 sps:$4 sm:$0xff]   ;;  %v2852_v26 = vld [vmem:[#allocation8] ss:$20 sps:$4 sm:$0xff]  }
 0x7c7   :  { %v2857_v27 = vld [vmem:[#allocation8 + $0xc] ss:$20 sps:$4 sm:$0xff]   ;;  %2085 = vmatprep.subr.bf16.mxu1 %v2854_v25 }
 0x7c8   :  { %v1498_v31 = vrot.slane %v1488_v28, %v3211_v36  ;;  %v2855_v28 = vld [vmem:[#allocation8 + $0x8] ss:$20 sps:$4 sm:$0xff]   ;;  %2128 = vmatprep.subr.bf16.mxu0 %v2857_v27 }
 0x7ca   :  { %v1499_v32 = vadd.f32 %v1498_v31, %v1493_v29  ;;  %v1500_v35 = vadd.f32 %v1498_v31, %v1494_v30  ;;  %v2860_v29 = vld [vmem:[#allocation8 + $0x2c] ss:$20 sps:$4 sm:$0xff]   ;;  %v2858_v30 = vld [vmem:[#allocation8 + $0x28] ss:$20 sps:$4 sm:$0xff]  }
 0x7cb   :  { %v2863_v31 = vld [vmem:[#allocation8 + $0x34] ss:$20 sps:$4 sm:$0xff]  }
 0x7cc   :  { %v1502_v37 = vmax.f32 %v1500_v35, 0.0  ;;  %v1501_v38 = vmax.f32 %v1499_v32, 0.0  ;;  %v2861_v32 = vld [vmem:[#allocation8 + $0x30] ss:$20 sps:$4 sm:$0xff]   ;;  %v2866_v35 = vld [vmem:[#allocation8 + $0x54] ss:$20 sps:$4 sm:$0xff]  }
 0x7ce   :  { %v1503_v39 = vpack.c.bf16 %v1502_v37, %v1501_v38  ;;  %v2864_v37 = vld [vmem:[#allocation8 + $0x50] ss:$20 sps:$4 sm:$0xff]  }
 0x7cf   :  { %v2869_v38 = vld [vmem:[#allocation8 + $0x5c] ss:$20 sps:$4 sm:$0xff]  }
 0x7d0   :  { %2681 = vmatmul.mubr.bf16.vlgmr.msra.gmra.mrb[16].mxu1 %v1503_v39  ;;  %v2867_v39 = vld [vmem:[#allocation8 + $0x58] ss:$20 sps:$4 sm:$0xff]  }
 0x7d1   :  { %2086 = vmatpush1.bf16.msra.mxu1 %v2852_v26  ;;  %v1784_v26 = vld [vmem:[#allocation10 + $0x11] sm:$0x1] }
 0x7d2   :  { %2087 = vmatprep.subr.bf16.mxu1 %v2860_v29 }
 0x7d5   :  { %2088 = vmatpush1.bf16.msra.mxu1 %v2858_v30 }
 0x7d6   :  { %2089 = vmatprep.subr.bf16.mxu1 %v2866_v35 }
 0x7d9   :  { %2090 = vmatpush1.bf16.msra.mxu1 %v2864_v37 }
 0x7da   :  { %2091 = vmatprep.subr.bf16.mxu1 %v2872_v40  ;;  %v2900_v40 = vld [vmem:[#allocation8 + $0x10] ss:$20 sps:$4 sm:$0xff]  }
 0x7dd   :  { %2092 = vmatpush1.bf16.msra.mxu1 %v2870_v41 }
 0x7de   :  { %2093 = vmatprep.subr.bf16.mxu1 %v2878_v44  ;;  %v2903_v44 = vld [vmem:[#allocation8 + $0x88] ss:$20 sps:$4 sm:$0xff]  }
 0x7e1   :  { %2094 = vmatpush1.bf16.msra.mxu1 %v2876_v45  ;;  %v2904_v45 = vld [vmem:[#allocation8 + $0xb0] ss:$20 sps:$4 sm:$0xff]  }
 0x8a3   :  { %v1603_v48 = vpop.f32.mrb[16].mxu1 }
 0x8a4   :  { %v2682_v49 = vpop.f32.mrb[17].mxu1  ;;  %v1618_v51 = vmul.f32 %v1603_v48, %v1603_v48 }
 0x8a5   :  { %v1606_v50 = vpop.f32.mrb[18].mxu1  ;;  %v2882_v49 = vld [vmem:[#allocation8 + $0xc8] ss:$20 sps:$4 sm:$0xff]  }
 0x8a6   :  { %v1610_v52 = vadd.f32 %v1606_v50, %v1603_v48  ;;  %v1619_v53 = vmul.f32 %v1606_v50, %v1606_v50  ;;  %v2683_v54 = vpop.f32.mrb[19].mxu1 }
 0x8a7   :  { %v2893_v54 = vld [vmem:[#allocation8 + $0xfc] ss:$20 sps:$4 sm:$0xff]  }
 0x8a8   :  { %v1611_v55 = vrot.slane %v1610_v52, 4  ;;  %v1620_v56 = vadd.f32 %v1619_v53, %v1618_v51  ;;  %v2885_v51 = vld [vmem:[#allocation8 + $0xd0] ss:$20 sps:$4 sm:$0xff]  }
 0x8a9   :  { %v2888_v53 = vld [vmem:[#allocation8 + $0xf0] ss:$20 sps:$4 sm:$0xff]  }
 0x8aa   :  { %v1612_v57 = vadd.f32 %v1611_v55, %v1610_v52  ;;  %v1621_v58 = vrot.slane %v1620_v56, 4  ;;  %v2890_v52 = vld [vmem:[#allocation8 + $0xf4] ss:$20 sps:$4 sm:$0xff]   ;;  %v2891_v55 = vld [vmem:[#allocation8 + $0xf8] ss:$20 sps:$4 sm:$0xff]  }
 0x8ac   :  { %v1613_v59 = vrot.slane %v1612_v57, 2  ;;  %v1622_v60 = vadd.f32 %v1621_v58, %v1620_v56  ;;  %v2896_v56 = vld [vmem:[#allocation8 + $0x11c] ss:$20 sps:$4 sm:$0xff]   ;;  %v2899_v58 = vld [vmem:[#allocation8 + $0x124] ss:$20 sps:$4 sm:$0xff]  }
 0x8ae   :  { %v1614_v61 = vadd.f32 %v1613_v59, %v1612_v57  ;;  %v1623_v62 = vrot.slane %v1622_v60, 2  ;;  %v2894_v57 = vld [vmem:[#allocation8 + $0x118] ss:$20 sps:$4 sm:$0xff]   ;;  %v2897_v59 = vld [vmem:[#allocation8 + $0x120] ss:$20 sps:$4 sm:$0xff]  }
 0x8b0   :  { %v1615_v63 = vrot.slane %v1614_v61, 1  ;;  %v1624_v0 = vadd.f32 %v1623_v62, %v1622_v60  ;;  %v3079_v60 = vmov 0  }
 0x8b1   :  { %2117 = vmatprep.mubr.bf16.mxu1 %v3079_v60 }
 0x8b2   :  { %v1616_v1 = vadd.f32 %v1615_v63, %v1614_v61  ;;  %v1625_v2 = vrot.slane %v1624_v0, 1 }
 0x8b4   :  { %v1617_v3 = vmul.f32 0.0625, %v1616_v1  ;;  %v1626_v4 = vadd.f32 %v1625_v2, %v1624_v0 }
 0x8b6   :  { %v1627_v5 = vmul.f32 0.0625, %v1626_v4  ;;  %v1628_v6 = vmul.f32 %v1617_v3, %v1617_v3 }
 0x8b8   :  { %v1629_v7 = vsub.f32 %v1627_v5, %v1628_v6 }
 0x8ba   :  { %v1630_v8 = vmax.f32 %v1629_v7, 0.0 }
 0x8bc   :  { %v1632_v9 = vadd.f32 1e-05, %v1630_v8 }
 0x8be   :  { %2922 = vrsqrt.f32 %v1632_v9 }
 0x8c8   :  { %v2923_v11 = vpop.eup %2922 }
 0x8c9   :  { %v1634_v12 = vmul.f32 %v2923_v11, %v1631_v10 }
 0x8cb   :  { %v1636_v14 = vmul.f32 %v1634_v12, %v1617_v3  ;;  %v1641_v15 = vrot.slane %v1634_v12, %v3211_v36 }
 0x8cd   :  { %v1637_v16 = vsub.f32 %v1635_v13, %v1636_v14  ;;  %v1642_v17 = vmul.f32 %v1641_v15, %v1603_v48  ;;  %v1643_v18 = vmul.f32 %v1641_v15, %v1606_v50  ;;  %v2884_v48 = vld [vmem:[#allocation8 + $0xcc] ss:$20 sps:$4 sm:$0xff]   ;;  %v2887_v50 = vld [vmem:[#allocation8 + $0xd4] ss:$20 sps:$4 sm:$0xff]  }
 0x8ce   :  { %2095 = vmatprep.subr.bf16.mxu1 %v2884_v48  ;;  %v2907_v48 = vld [vmem:[#allocation8 + $0x128] ss:$20 sps:$4 sm:$0xff]  }
 0x8cf   :  { %v1647_v19 = vrot.slane %v1637_v16, %v3211_v36  ;;  %2096 = vmatpush1.bf16.msra.mxu1 %v2882_v49  ;;  %v1862_v49 = vsub.s32 2, %v3208_v33 }
 0x8d0   :  { %2097 = vmatprep.subr.bf16.mxu1 %v2890_v52  ;;  %v1866_v52 = vsub.s32 3, %v3208_v33 }
 0x8d1   :  { %v1648_v20 = vadd.f32 %v1647_v19, %v1642_v17  ;;  %v1649_v21 = vadd.f32 %v1647_v19, %v1643_v18 }
 0x8d3   :  { %v1651_v22 = vmax.f32 %v1649_v21, 0.0  ;;  %v1650_v23 = vmax.f32 %v1648_v20, 0.0  ;;  %2098 = vmatpush1.bf16.msra.mxu1 %v2888_v53 }
 0x8d4   :  { %2099 = vmatprep.subr.bf16.mxu1 %v2896_v56 }
 0x8d5   :  { %v1652_v24 = vpack.c.bf16 %v1651_v22, %v1650_v23  ;;  %v1780_v23 = vld [vmem:[#allocation10 + $0x8] sm:$0x1] }
 0x8d7   :  { %2701 = vmatmul.mubr.bf16.vlgmr.msra.gmra.mrb[20].mxu0 %v1652_v24  ;;  %2100 = vmatpush1.bf16.msra.mxu1 %v2894_v57 }
 0x8d8   :  { %2129 = vmatpush1.bf16.msra.mxu0 %v2855_v28  ;;  %2160 = vmatprep.mubr.bf16.mxu0 %v3079_v60 }
 0x8d9   :  { %2130 = vmatprep.subr.bf16.mxu0 %v2863_v31  ;;  %2704 = vmatprep.subr.bf16.mxu1 %v3077_v34 }
 0x8dc   :  { %2131 = vmatpush1.bf16.msra.mxu0 %v2861_v32 }
 0x8dd   :  { %2132 = vmatprep.subr.bf16.mxu0 %v2869_v38 }
 0x8e0   :  { %2133 = vmatpush1.bf16.msra.mxu0 %v2867_v39 }
 0x8e1   :  { %2134 = vmatprep.subr.bf16.mxu0 %v2875_v42  ;;  %v2901_v42 = vld [vmem:[#allocation8 + $0x38] ss:$20 sps:$4 sm:$0xff]  }
 0x8e4   :  { %2135 = vmatpush1.bf16.msra.mxu0 %v2873_v43  ;;  %v2902_v43 = vld [vmem:[#allocation8 + $0x60] ss:$20 sps:$4 sm:$0xff]  }
 0x8e5   :  { %2136 = vmatprep.subr.bf16.mxu0 %v2881_v46  ;;  %v2905_v46 = vld [vmem:[#allocation8 + $0xd8] ss:$20 sps:$4 sm:$0xff]  }
 0x8e8   :  { %2137 = vmatpush1.bf16.msra.mxu0 %v2879_v47  ;;  %v2906_v47 = vld [vmem:[#allocation8 + $0x100] ss:$20 sps:$4 sm:$0xff]  }
 0x8e9   :  { %2138 = vmatprep.subr.bf16.mxu0 %v2887_v50  ;;  %v1850_v50 = vld [vmem:[%s3331_s4] sm:$0x1f]  ;;  %s3080_s4 = smov [#allocation11]  }
 0x8ea   :  { %v1855_v53 = vrot.slane %v1850_v50, %v3211_v36  ;;  %v1867_v56 = vrot.slane %v1850_v50, %v1866_v52  ;;  %s2227_s12 = sshll.u32 %s3080_s4, 4  ;;  %s2228_s12 = int_to_ptr.vmem [resolvable:$true] %s2227_s12 }
 0x8eb   :  { %s3036_s13 = scalar_lea.vmem %s2228_s12, 1280  ;;  %p3041_p13 = scmp.lt.s32.totalorder %s2228_s12, %s2228_s12 }
 0x8ec   :  { %2139 = vmatpush1.bf16.msra.mxu0 %v2885_v51  ;;  %v1858_v51 = vsub.s32 1, %v3208_v33  ;;  %p3037_p12 = scmp.ne.s32.totalorder %s2228_s12, %s3036_s13  ;;  %p3042_p0 = scmp.lt.s32.totalorder %s3036_s13, %s3036_s13 }
 0x8ed   :  { %2140 = vmatprep.subr.bf16.mxu0 %v2893_v54  ;;  %v1863_v54 = vrot.slane %v1850_v50, %v1862_v49 }
 0x8ee   :  { %p3043_p1 = por %p3042_p0, %p3041_p13 }
 0x8f0   :  { %2141 = vmatpush1.bf16.msra.mxu0 %v2891_v55  ;;  %v1859_v55 = vrot.slane %v1850_v50, %v1858_v51  ;;  %p3044_p2 = pnand %p3043_p1, %p3037_p12 }
 0x8f1   :  { %2142 = vmatprep.subr.bf16.mxu0 %v2899_v58 }
 0x8f4   :  { %2143 = vmatpush1.bf16.msra.mxu0 %v2897_v59 }
 0x9aa   :  { %v1752_v61 = vpop.f32.mrb[20].mxu0 }
 0x9ab   :  { %v2702_v62 = vpop.f32.mrb[21].mxu0  ;;  %v1767_v0 = vmul.f32 %v1752_v61, %v1752_v61 }
 0x9ac   :  { %v1755_v63 = vpop.f32.mrb[22].mxu0 }
 0x9ad   :  { %v1759_v1 = vadd.f32 %v1755_v63, %v1752_v61  ;;  %v1768_v2 = vmul.f32 %v1755_v63, %v1755_v63  ;;  %v2703_v3 = vpop.f32.mrb[23].mxu0 }
 0x9af   :  { %v1760_v4 = vrot.slane %v1759_v1, 4  ;;  %v1769_v5 = vadd.f32 %v1768_v2, %v1767_v0 }
 0x9b1   :  { %v1761_v6 = vadd.f32 %v1760_v4, %v1759_v1  ;;  %v1770_v7 = vrot.slane %v1769_v5, 4 }
 0x9b3   :  { %v1762_v8 = vrot.slane %v1761_v6, 2  ;;  %v1771_v9 = vadd.f32 %v1770_v7, %v1769_v5  ;;  %v1870_v7 = vsub.s32 4, %v3208_v33 }
 0x9b5   :  { %v1763_v10 = vadd.f32 %v1762_v8, %v1761_v6  ;;  %v1772_v11 = vrot.slane %v1771_v9, 2  ;;  %v1871_v8 = vrot.slane %v1850_v50, %v1870_v7 }
 0x9b7   :  { %v1764_v12 = vrot.slane %v1763_v10, 1  ;;  %v1773_v13 = vadd.f32 %v1772_v11, %v1771_v9 }
 0x9b9   :  { %v1765_v14 = vadd.f32 %v1764_v12, %v1763_v10  ;;  %v1774_v15 = vrot.slane %v1773_v13, 1 }
 0x9bb   :  { %v1766_v16 = vmul.f32 0.0625, %v1765_v14  ;;  %v1775_v17 = vadd.f32 %v1774_v15, %v1773_v13 }
 0x9bd   :  { %v1776_v18 = vmul.f32 0.0625, %v1775_v17  ;;  %v1777_v19 = vmul.f32 %v1766_v16, %v1766_v16 }
 0x9bf   :  { %v1778_v20 = vsub.f32 %v1776_v18, %v1777_v19 }
 0x9c1   :  { %v1779_v21 = vmax.f32 %v1778_v20, 0.0 }
 0x9c3   :  { %v1781_v22 = vadd.f32 1e-05, %v1779_v21 }
 0x9c5   :  { %2924 = vrsqrt.f32 %v1781_v22 }
 0x9cf   :  { %v2925_v24 = vpop.eup %2924 }
 0x9d0   :  { %v1783_v25 = vmul.f32 %v2925_v24, %v1780_v23 }
 0x9d2   :  { %v1785_v27 = vmul.f32 %v1783_v25, %v1766_v16  ;;  %v1790_v28 = vrot.slane %v1783_v25, %v3211_v36 }
 0x9d4   :  { %v1786_v29 = vsub.f32 %v1784_v26, %v1785_v27  ;;  %v1791_v30 = vmul.f32 %v1790_v28, %v1752_v61  ;;  %v1792_v31 = vmul.f32 %v1790_v28, %v1755_v63 }
 0x9d6   :  { %v1796_v32 = vrot.slane %v1786_v29, %v3211_v36 }
 0x9d8   :  { %v1797_v35 = vadd.f32 %v1796_v32, %v1791_v30  ;;  %v1798_v37 = vadd.f32 %v1796_v32, %v1792_v31 }
 0x9da   :  { %v1800_v38 = vmax.f32 %v1798_v37, 0.0  ;;  %v1799_v39 = vmax.f32 %v1797_v35, 0.0 }
 0x9dc   :  { %v1801_v41 = vpack.c.bf16 %v1800_v38, %v1799_v39 }
 0x9de   :  { %2118 = vmatmul.mubr.bf16.vlgmr.msra.gmra.mrb[20].mxu1 %v1801_v41  ;;  %2161 = vmatmul.mubr.bf16.vlgmr.msra.gmra.mrb[24].mxu0 %v1801_v41 }
 0x9df   :  { %2705 = vmatpush3.bf16.msra.mxu1 %v2900_v40  ;;  %2720 = vmatprep.mubr.msk.bf16.mxu1 %vm3078_vm0, %v3077_v34 }
 0x9e0   :  { %2706 = vmatprep.subr.bf16.mxu1 %v3077_v34 }
 0x9e3   :  { %2707 = vmatpush3.bf16.msra.mxu1 %v2901_v42 }
 0x9e4   :  { %2708 = vmatprep.subr.bf16.mxu1 %v3077_v34 }
 0x9e7   :  { %2709 = vmatpush3.bf16.msra.mxu1 %v2902_v43 }
 0x9e8   :  { %2710 = vmatprep.subr.bf16.mxu1 %v3077_v34 }
 0x9eb   :  { %2711 = vmatpush3.bf16.msra.mxu1 %v2903_v44 }
 0x9ec   :  { %2712 = vmatprep.subr.bf16.mxu1 %v3077_v34 }
 0x9ef   :  { %2713 = vmatpush3.bf16.msra.mxu1 %v2904_v45 }
 0x9f0   :  { %2714 = vmatprep.subr.bf16.mxu1 %v3077_v34 }
 0x9f3   :  { %2715 = vmatpush3.bf16.msra.mxu1 %v2905_v46 }
 0x9f4   :  { %2716 = vmatprep.subr.bf16.mxu1 %v3077_v34 }
 0x9f7   :  { %2717 = vmatpush3.bf16.msra.mxu1 %v2906_v47 }
 0x9f8   :  { %2718 = vmatprep.subr.bf16.mxu1 %v3077_v34 }
 0x9fb   :  { %2719 = vmatpush3.bf16.msra.mxu1 %v2907_v48 }
 0x9fe   :  { %2721 = vmatmul.mubr.bf16.vlgmr.msra.gmra.mrb[24].mxu1 %v1801_v41 }
 0xab1   :  { %v2119_v57 = vpop.f32.mrb[20].mxu1  ;;  %v2162_v58 = vpop.f32.mrb[24].mxu0 }
 0xab2   :  { %v2120_v34 = vadd.f32 %v2119_v57, %v1855_v53  ;;  %v2163_v59 = vadd.f32 %v2162_v58, %v1863_v54  ;;  %v2121_v60 = vpop.f32.mrb[21].mxu1  ;;  %v2164_v61 = vpop.f32.mrb[25].mxu0 }
 0xab3   :  { %v2122_v62 = vadd.f32 %v2121_v60, %v1859_v55  ;;  %v2165_v63 = vadd.f32 %v2164_v61, %v1867_v56  ;;  %v2123_v0 = vpop.f32.mrb[22].mxu1  ;;  %v2166_v1 = vpop.f32.mrb[26].mxu0 }
 0xab4   :  { %2212 = vst [vmem:[#allocation11] sm:$0xff] %v2120_v34  ;;  %2214 = vst [vmem:[#allocation11 + $0x10] sm:$0xff] %v2163_v59  ;;  %v2124_v2 = vadd.f32 %v2123_v0, %v1855_v53  ;;  %v2167_v3 = vadd.f32 %v2166_v1, %v1863_v54  ;;  %v2125_v4 = vpop.f32.mrb[23].mxu1  ;;  %v2168_v5 = vpop.f32.mrb[27].mxu0 }
 0xab5   :  { %2213 = vst [vmem:[#allocation11 + $0x8] sm:$0xff] %v2122_v62  ;;  %2215 = vst [vmem:[#allocation11 + $0x18] sm:$0xff] %v2165_v63  ;;  %v2126_v36 = vadd.f32 %v2125_v4, %v1859_v55  ;;  %v2169_v6 = vadd.f32 %v2168_v5, %v1867_v56 }
 0xab6   :  { %2217 = vst [vmem:[#allocation11 + $0x28] sm:$0xff] %v2124_v2  ;;  %2219 = vst [vmem:[#allocation11 + $0x38] sm:$0xff] %v2167_v3 }
 0xab7   :  { %2218 = vst [vmem:[#allocation11 + $0x30] sm:$0xff] %v2126_v36  ;;  %2220 = vst [vmem:[#allocation11 + $0x40] sm:$0xff] %v2169_v6 }
 0xad1   :  { %v2205_v9 = vpop.f32.mrb[24].mxu1 }
 0xad2   :  { %v2206_v10 = vadd.f32 %v2205_v9, %v1871_v8  ;;  %v2722_v11 = vpop.f32.mrb[25].mxu1 }
 0xad3   :  { %v2208_v12 = vpop.f32.mrb[26].mxu1 }
 0xad4   :  { %2216 = vst [vmem:[#allocation11 + $0x20] sm:$0xff] %v2206_v10  ;;  %v2209_v13 = vadd.f32 %v2208_v12, %v1871_v8  ;;  %v2723_v14 = vpop.f32.mrb[27].mxu1 }
 0xad6   :  { %2221 = vst [vmem:[#allocation11 + $0x48] sm:$0xff] %v2209_v13 }
 0xad7   :  { %3047 = shalt.err (!%p3044_p2)
}
 0xad8   :  { %s3048_s17 = scalar_lea.hbm %s3333_s6, 1280 }
 0xad9   :  { %p3049_p3 = scmp.ne.s32.totalorder %s3333_s6, %s3048_s17  ;;  %p3052_p4 = scmp.lt.u32.totalorder %s3048_s17, %s3333_s6 }
 0xadb   :  { %p3054_p5 = pnand %p3052_p4, %p3049_p3 }
 0xadd   :  { %3057 = shalt.err (!%p3054_p5)
}
 0xade   :  { %s3081_s1 = smov 640   ;;  %s3082_s24 = smov 40  }
 0xadf   :  { %2233 = dma.vmem_to_hbm [thread:$0]  %s2228_s12, 1280, %s3333_s6, [#allocation4], %s3081_s1, %s3081_s1, %s3082_s24  }
 0xae0   :  { %3064 = dma.done.wait [#allocation4], 1280  }
 0xae1   :  { %3065 = vsyncadd [#allocation4], 4294966016 }
 0xae2   :  { %2237 = vsyncpa [#allocation3], 1 }
 0xae3   :  { %2238 = vsyncpa [#allocation6], 1 }
 0xae4   :  { %2239 = vsyncpa [#allocation9], 1 }
 0xae5   :  { %2240 = vsyncpa [#allocation4], 1 }

</bundles_post_ra>
